<compile_context>
chip_gen: v6e
topology: v6e:2x2x1
jax: 0.10.0
libtpu: 0.0.40
codegen_flags: <defaults>
</compile_context>

<pallas_src>
import re
from functools import partial

import numpy as np
import jax
import jax.numpy as jnp
from jax.experimental import pallas as pl
from jax.experimental.pallas import tpu as pltpu


def _round_up(x, m):
    return ((x + m - 1) // m) * m


# -----------------------------------------------------------------------------
# Pallas kernel: one grid step == one tree level (batched TreeLSTM cell).
# -----------------------------------------------------------------------------
def _tree_lstm_level_kernel(
    # scalar prefetch (SMEM)
    nvalid_ref,     # (num_levels,) int32 : number of real nodes per level
    # inputs (VMEM)
    cidx_ref,       # (M, n_ary) int32    : child state-row indices (this level)
    x_ref,          # (M, Ep)    f32      : embeddings (this level, lane-padded)
    w_ref,          # (Ep+n*Hp, (3+n)*Hp) bf16 : fused [Wx_rep ; Wu]  (resident)
    b_ref,          # (1, (3+n)*Hp) f32                                (resident)
    hc0_ref,        # (n_ary, 2*Hp) f32   : [h0_j | c0_j] chunks       (resident)
    # output (resident across levels -> doubles as the node-state buffer)
    state_ref,      # (n_state, 2*Hp) f32 : rows = [h | c] per node
    *,
    M, Hp, n_ary, n_state, n_node_rows,
):
    lvl = pl.program_id(0)

    # Level 0: zero the state buffer, install the learned (h0, c0) chunks
    # (rows n_node_rows..n_node_rows+n_ary-1) and the implicit all-zero
    # "missing child" row, before any leaf gathers them.
    @pl.when(lvl == 0)
    def _init():
        state_ref[...] = jnp.zeros_like(state_ref)
        state_ref[n_node_rows:n_node_rows + n_ary, :] = hc0_ref[...]

    # --- one-hot matmul gather of the n_ary children (h | c) per row ----------
    idx = cidx_ref[...]                                           # (M, n_ary)
    col = jax.lax.broadcasted_iota(jnp.int32, (M, n_state), 1)    # (M, n_state)
    state = state_ref[...]                                        # (n_state, 2*Hp)

    h_parts, c_parts = [], []
    for j in range(n_ary):
        sel = (col == idx[:, j:j + 1]).astype(jnp.float32)        # (M, n_state)
        g = jnp.dot(sel, state, preferred_element_type=jnp.float32)  # (M, 2*Hp)
        h_parts.append(g[:, :Hp])
        c_parts.append(g[:, Hp:])

    # --- single fused gate matmul on [x | h_0 .. h_{n-1}] (bf16 MXU, f32 acc) --
    op = jnp.concatenate([x_ref[...]] + h_parts, axis=1)          # (M, Ep+n*Hp)
    pre = jnp.dot(op.astype(w_ref.dtype), w_ref[...],
                  preferred_element_type=jnp.float32) + b_ref[...]

    def sig(v):
        # exp -> EUP, approx reciprocal -> EUP (frees the VPU divide)
        return pl.reciprocal(1.0 + jnp.exp(-v), approx=True)

    i_g = sig(pre[:, 0:Hp])
    o_g = sig(pre[:, Hp:2 * Hp])
    u_g = jnp.tanh(pre[:, 2 * Hp:3 * Hp])

    fc_sum = None
    for j in range(n_ary):
        f_j = sig(pre[:, (3 + j) * Hp:(4 + j) * Hp])
        term = f_j * c_parts[j]
        fc_sum = term if fc_sum is None else fc_sum + term

    c_new = i_g * u_g + fc_sum
    h_new = o_g * jnp.tanh(c_new)

    # --- mask pad rows of this level and store lane-dense into resident state -
    rows = jax.lax.broadcasted_iota(jnp.int32, (M, 1), 0)
    mask = (rows < nvalid_ref[lvl]).astype(jnp.float32)
    out = jnp.concatenate([h_new * mask, c_new * mask], axis=1)   # (M, 2*Hp)
    row0 = pl.multiple_of(lvl * M, 8)
    state_ref[pl.ds(row0, M), :] = out


# -----------------------------------------------------------------------------
# Single gridded pallas_call over levels.
# -----------------------------------------------------------------------------
@partial(jax.jit, static_argnames=("num_levels", "M", "Hp", "Ep", "n_ary",
                                   "n_node_rows", "n_state"))
def _run_tree_lstm(nvalid, child_idx, node_emb, W, b, hc0, *,
                   num_levels, M, Hp, Ep, n_ary, n_node_rows, n_state):
    Kf = Ep + n_ary * Hp
    G = (3 + n_ary) * Hp
    kernel = partial(_tree_lstm_level_kernel, M=M, Hp=Hp, n_ary=n_ary,
                     n_state=n_state, n_node_rows=n_node_rows)
    grid_spec = pltpu.PrefetchScalarGridSpec(
        num_scalar_prefetch=1,
        grid=(num_levels,),
        in_specs=[
            # streamed per level
            pl.BlockSpec((M, n_ary), lambda l, nv: (l, 0)),
            pl.BlockSpec((M, Ep), lambda l, nv: (l, 0)),
            # resident (constant block index across the whole grid)
            pl.BlockSpec((Kf, G), lambda l, nv: (0, 0)),
            pl.BlockSpec((1, G), lambda l, nv: (0, 0)),
            pl.BlockSpec((n_ary, 2 * Hp), lambda l, nv: (0, 0)),
        ],
        out_specs=pl.BlockSpec((n_state, 2 * Hp), lambda l, nv: (0, 0)),
    )
    return pl.pallas_call(
        kernel,
        grid_spec=grid_spec,
        out_shape=jax.ShapeDtypeStruct((n_state, 2 * Hp), jnp.float32),
        compiler_params=pltpu.CompilerParams(
            dimension_semantics=("arbitrary",),
            vmem_limit_bytes=32 * 1024 * 1024,
        ),
    )(nvalid, child_idx, node_emb, W, b, hc0)


# -----------------------------------------------------------------------------
# Module wrapper (host-side tree flattening + Pallas call + output reordering).
# -----------------------------------------------------------------------------
class SyntaxTransferEncoderPallas:
    """JAX/Pallas port of SyntaxTransferEncoder.forward (bottom_up=True)."""

    def __init__(self, embedding_dim, hidden_dim, n_ary=4, key=None):
        if key is None:
            key = jax.random.PRNGKey(0)
        E, H, n = embedding_dim, hidden_dim, n_ary
        self.embedding_dim, self.hidden_dim, self.n_ary = E, H, n
        self.Hp = _round_up(H, 128)       # lane-dense hidden
        self.Ep = _round_up(E, 128)       # lane-dense embedding
        ks = jax.random.split(key, 10)

        def lin(kw, kb, fan_in, fan_out):
            bound = 1.0 / np.sqrt(fan_in)
            w = jax.random.uniform(kw, (fan_in, fan_out), jnp.float32, -bound, bound)
            bb = jax.random.uniform(kb, (1, fan_out), jnp.float32, -bound, bound)
            return w, bb

        self.w_iou, self.b_iou = lin(ks[0], ks[1], E, 3 * H)          # W_iou
        self.w_f, self.b_f = lin(ks[2], ks[3], E, H)                  # W_f
        self.u_iou, self.bu_iou = lin(ks[4], ks[5], n * H, 3 * H)     # U_iou
        self.u_f, self.bu_f = lin(ks[6], ks[7], n * H, n * H)         # U_f
        self.h0 = jax.random.uniform(ks[8], (1, n * H), jnp.float32)
        self.c0 = jax.random.uniform(ks[9], (1, n * H), jnp.float32)

        # --- fused, lane-padded kernel weights --------------------------------
        # rows: [x (Ep) | h_0 (Hp) | ... | h_{n-1} (Hp)]
        # cols: [i (Hp) | o (Hp) | u (Hp) | f_0 (Hp) | ... | f_{n-1} (Hp)]
        Hp, Ep = self.Hp, self.Ep
        Kf, G = Ep + n * Hp, (3 + n) * Hp
        W = np.zeros((Kf, G), np.float32)
        b = np.zeros((1, G), np.float32)
        w_iou, w_f = np.asarray(self.w_iou), np.asarray(self.w_f)
        u_iou, u_f = np.asarray(self.u_iou), np.asarray(self.u_f)
        b_iou, b_f = np.asarray(self.b_iou), np.asarray(self.b_f)
        bu_iou, bu_f = np.asarray(self.bu_iou), np.asarray(self.bu_f)

        for g in range(3):   # i, o, u
            W[0:E, g * Hp:g * Hp + H] = w_iou[:, g * H:(g + 1) * H]
            b[0, g * Hp:g * Hp + H] = (b_iou[0, g * H:(g + 1) * H]
                                       + bu_iou[0, g * H:(g + 1) * H])
        for j in range(n):
            # forget gate: W_f columns replicated per child (folded host-side)
            W[0:E, (3 + j) * Hp:(3 + j) * Hp + H] = w_f
            b[0, (3 + j) * Hp:(3 + j) * Hp + H] = (b_f[0]
                                                   + bu_f[0, j * H:(j + 1) * H])
            r0 = Ep + j * Hp
            for g in range(3):
                W[r0:r0 + H, g * Hp:g * Hp + H] = \
                    u_iou[j * H:(j + 1) * H, g * H:(g + 1) * H]
            for k in range(n):
                W[r0:r0 + H, (3 + k) * Hp:(3 + k) * Hp + H] = \
                    u_f[j * H:(j + 1) * H, k * H:(k + 1) * H]

        self.W_fused = jnp.asarray(W, jnp.bfloat16)    # bf16 MXU operand
        self.b_fused = jnp.asarray(b, jnp.float32)

        hc0 = np.zeros((n, 2 * Hp), np.float32)        # [h0_j | c0_j] per child
        hc0[:, 0:H] = np.asarray(self.h0).reshape(n, H)
        hc0[:, Hp:Hp + H] = np.asarray(self.c0).reshape(n, H)
        self.hc0 = jnp.asarray(hc0)

    # ---- host-side flattening of the syntax tree into a level schedule -------
    def _build_schedule(self, syntax, root="ROOT"):
        n_ary = self.n_ary
        level, post_order = {}, []

        def visit(node):
            if node not in syntax:
                lvl = 0
            else:
                children = syntax[node]
                assert len(children) <= n_ary, "node arity exceeds n_ary"
                lvl = 1 + max(visit(ch) for ch in children)
            level[node] = lvl
            post_order.append(node)
            return lvl

        visit(root)
        num_levels = max(level.values()) + 1
        by_level = [[] for _ in range(num_levels)]
        for node in post_order:
            by_level[level[node]].append(node)
        max_width = max(len(v) for v in by_level)
        M = max(8, _round_up(max_width, 8))

        flat = {}
        for lvl, nodes in enumerate(by_level):
            for p, node in enumerate(nodes):
                flat[node] = lvl * M + p

        n_node_rows = num_levels * M
        h0_base = n_node_rows                    # rows holding the h0/c0 chunks
        zero_row = n_node_rows + n_ary           # all-zero "missing child" row
        n_state = _round_up(zero_row + 1, 8)

        child_idx = np.full((num_levels * M, n_ary), zero_row, dtype=np.int32)
        for node in post_order:
            fi = flat[node]
            if node not in syntax:               # leaf -> h0/c0 chunk rows
                child_idx[fi, :] = np.arange(h0_base, h0_base + n_ary,
                                             dtype=np.int32)
            else:
                for j, ch in enumerate(syntax[node]):
                    child_idx[fi, j] = flat[ch]

        nvalid = np.array([len(v) for v in by_level], dtype=np.int32)
        post_flat = np.array([flat[nd] for nd in post_order], dtype=np.int32)
        return (post_order, flat, num_levels, M, n_node_rows, n_state,
                child_idx, nvalid, post_flat)

    def forward(self, syntax, embeddings, bottom_up=True):
        assert bottom_up, "only bottom_up=True is implemented (as in the spec)"
        E, H, n = self.embedding_dim, self.hidden_dim, self.n_ary
        Hp, Ep = self.Hp, self.Ep
        (post_order, flat, num_levels, M, n_node_rows, n_state,
         child_idx, nvalid, post_flat) = self._build_schedule(syntax)

        # level-ordered, lane-padded embedding table (pad rows/cols = 0)
        node_emb = np.zeros((num_levels * M, Ep), dtype=np.float32)
        for node in post_order:
            lemma = re.sub(r"-\d+", "", node)
            node_emb[flat[node], 0:E] = np.asarray(
                embeddings.get_embedding(lemma)).reshape(-1)

        state = _run_tree_lstm(
            jnp.asarray(nvalid), jnp.asarray(child_idx), jnp.asarray(node_emb),
            self.W_fused, self.b_fused, self.hc0,
            num_levels=num_levels, M=M, Hp=Hp, Ep=Ep, n_ary=n,
            n_node_rows=n_node_rows, n_state=n_state)

        sel = jnp.asarray(post_flat)
        out_h = state[sel, 0:H][None, :, :]          # (1, num_nodes, H), DFS post-order
        out_c = state[sel, Hp:Hp + H][None, :, :]
        return out_h, out_c


# -----------------------------------------------------------------------------
# Pure-JAX reference (mirrors the PyTorch recursion) for verification.
# -----------------------------------------------------------------------------
def reference_forward(encoder, syntax, embeddings):
    H, n = encoder.hidden_dim, encoder.n_ary
    w_iou, b_iou = encoder.w_iou, encoder.b_iou
    w_f, b_f = encoder.w_f, encoder.b_f
    u_iou, bu_iou = encoder.u_iou, encoder.bu_iou
    u_f, bu_f = encoder.u_f, encoder.bu_f
    h0, c0 = encoder.h0, encoder.c0

    def sig(x):
        return 1.0 / (1.0 + jnp.exp(-x))

    def cell(x, h, c):
        iou = x @ w_iou + b_iou + h @ u_iou + bu_iou
        i = sig(iou[:, :H]); o = sig(iou[:, H:2 * H]); u = jnp.tanh(iou[:, 2 * H:3 * H])
        f = sig((h @ u_f + bu_f).reshape(1, n, H) + (x @ w_f + b_f)[:, None, :])
        c_new = i * u + jnp.sum(f * c.reshape(1, n, H), axis=1)
        h_new = o * jnp.tanh(c_new)
        return h_new, c_new

    out_h, out_c = [], []

    def dfs(node):
        lemma = re.sub(r"-\d+", "", node)
        x = jnp.asarray(embeddings.get_embedding(lemma)).reshape(1, -1)
        if node not in syntax:
            h, c = cell(x, h0, c0)
        else:
            hbuf = jnp.zeros((1, n * H), jnp.float32)
            cbuf = jnp.zeros((1, n * H), jnp.float32)
            for i, ch in enumerate(syntax[node]):
                sh, sc = dfs(ch)
                hbuf = hbuf.at[:, i * H:(i + 1) * H].set(sh)
                cbuf = cbuf.at[:, i * H:(i + 1) * H].set(sc)
            h, c = cell(x, hbuf, cbuf)
        out_h.append(h)
        out_c.append(c)
        return h, c

    dfs("ROOT")
    return (jnp.stack(out_h).transpose(1, 0, 2),
            jnp.stack(out_c).transpose(1, 0, 2))


class ToyEmbeddings:
    """Deterministic stand-in for the `embeddings` object in the spec."""

    def __init__(self, lemmas, embedding_dim, key):
        lemmas = sorted(lemmas)
        self.index = {l: i for i, l in enumerate(lemmas)}
        self.table = jax.random.normal(
            key, (len(lemmas), embedding_dim), jnp.float32) * 0.5

    def get_embedding(self, lemma):
        return self.table[self.index[lemma]]


if __name__ == "__main__":
    embedding_dim, hidden_dim, n_ary = 64, 32, 4

    syntax = {
        "ROOT": ["S-1"],
        "S-1": ["NP-1", "VP-1", "PUNCT-1"],
        "NP-1": ["DT-1", "NN-1"],
        "VP-1": ["VBZ-1", "NP-2"],
        "NP-2": ["DT-2", "JJ-1", "NN-2"],
    }

    # collect reachable nodes -> lemma vocab
    nodes, stack = {"ROOT"}, ["ROOT"]
    while stack:
        nd = stack.pop()
        for ch in syntax.get(nd, []):
            nodes.add(ch)
            stack.append(ch)
    lemmas = {re.sub(r"-\d+", "", nd) for nd in nodes}

    key = jax.random.PRNGKey(0)
    k_emb, k_enc = jax.random.split(key)
    embeddings = ToyEmbeddings(lemmas, embedding_dim, k_emb)
    encoder = SyntaxTransferEncoderPallas(embedding_dim, hidden_dim, n_ary,
                                          key=k_enc)

    out_h, out_c = encoder.forward(syntax, embeddings)
    out_h, out_c = jax.block_until_ready((out_h, out_c))

    ref_h, ref_c = reference_forward(encoder, syntax, embeddings)
    ref_h, ref_c = jax.block_until_ready((ref_h, ref_c))

    assert out_h.shape == ref_h.shape and out_c.shape == ref_c.shape, \
        (out_h.shape, ref_h.shape)

    ok = (bool(jnp.all(jnp.isfinite(out_h)))
          and bool(jnp.all(jnp.isfinite(out_c)))
          and bool(jnp.allclose(out_h, ref_h, rtol=5e-2, atol=5e-2))
          and bool(jnp.allclose(out_c, ref_c, rtol=5e-2, atol=5e-2)))
    if ok:
        print("KERNEL_OK")
    else:
        print("MISMATCH: max|dh|=%.3e max|dc|=%.3e" % (
            float(jnp.max(jnp.abs(out_h - ref_h))),
            float(jnp.max(jnp.abs(out_c - ref_c)))))
</pallas_src>

<mosaic_0001>
module attributes {stable_mosaic.version = 11 : i64} {
  func.func @_tree_lstm_level_kernel(%arg0: i32, %arg1: memref<5xi32, #tpu.memory_space<smem>>, %arg2: memref<8x4xi32, #tpu.memory_space<vmem>>, %arg3: memref<8x128xf32, #tpu.memory_space<vmem>>, %arg4: memref<640x896xbf16, #tpu.memory_space<vmem>>, %arg5: memref<1x896xf32, #tpu.memory_space<vmem>>, %arg6: memref<4x256xf32, #tpu.memory_space<vmem>>, %arg7: memref<48x256xf32, #tpu.memory_space<vmem>>) attributes {dimension_semantics = [#tpu.dimension_semantics<arbitrary>], iteration_bounds = array<i64: 5>, scalar_prefetch = 1 : i64, scratch_operands = 0 : i64, tpu.core_type = #tpu.core_type<tc>, window_params = [{transform_indices = @transform_0, window_bounds = array<i64: 8, 4>}, {transform_indices = @transform_1, window_bounds = array<i64: 8, 128>}, {pipeline_mode = #tpu.pipeline_mode<synchronous>, transform_indices = @transform_2, window_bounds = array<i64: 640, 896>}, {pipeline_mode = #tpu.pipeline_mode<synchronous>, transform_indices = @transform_3, window_bounds = array<i64: 1, 896>}, {pipeline_mode = #tpu.pipeline_mode<synchronous>, transform_indices = @transform_4, window_bounds = array<i64: 4, 256>}, {pipeline_mode = #tpu.pipeline_mode<synchronous>, transform_indices = @transform_5, window_bounds = array<i64: 48, 256>}]} {
    %c0_i32 = arith.constant 0 : i32
    %0 = arith.cmpi eq, %arg0, %c0_i32 : i32
    %1 = arith.extui %0 : i1 to i32
    %c0_i32_0 = arith.constant 0 : i32
    %2 = arith.cmpi ne, %1, %c0_i32_0 : i32
    scf.if %2 {
      %cst_27 = arith.constant 0.000000e+00 : f32
      %117 = vector.broadcast %cst_27 : f32 to vector<48x256xf32>
      %c0_28 = arith.constant 0 : index
      %c0_29 = arith.constant 0 : index
      %118 = vector.load %arg7[%c0_28, %c0_29] : memref<48x256xf32, #tpu.memory_space<vmem>>, vector<48x256xf32>
      tpu.vector_store %arg7[%c0_28, %c0_29], %117 {strides = array<i32>} : memref<48x256xf32, #tpu.memory_space<vmem>>, vector<48x256xf32>,
      %c0_30 = arith.constant 0 : index
      %c0_31 = arith.constant 0 : index
      %119 = vector.load %arg6[%c0_30, %c0_31] : memref<4x256xf32, #tpu.memory_space<vmem>>, vector<4x256xf32>
      %c40 = arith.constant 40 : index
      %c0_32 = arith.constant 0 : index
      %120 = vector.load %arg7[%c40, %c0_32] : memref<48x256xf32, #tpu.memory_space<vmem>>, vector<4x256xf32>
      tpu.vector_store %arg7[%c40, %c0_32], %119 {strides = array<i32>} : memref<48x256xf32, #tpu.memory_space<vmem>>, vector<4x256xf32>,
    } else {
    }
    %c0 = arith.constant 0 : index
    %c0_1 = arith.constant 0 : index
    %3 = vector.load %arg2[%c0, %c0_1] : memref<8x4xi32, #tpu.memory_space<vmem>>, vector<8x4xi32>
    %4 = tpu.iota {dimensions = array<i32: 1>} : vector<8x48xi32>
    %c0_2 = arith.constant 0 : index
    %c0_3 = arith.constant 0 : index
    %5 = vector.load %arg7[%c0_2, %c0_3] : memref<48x256xf32, #tpu.memory_space<vmem>>, vector<48x256xf32>
    %6 = vector.extract_strided_slice %3 {offsets = [0, 0], sizes = [8, 1], strides = [1, 1]} : vector<8x4xi32> to vector<8x1xi32>
    %7 = vector.broadcast %6 : vector<8x1xi32> to vector<8x48xi32>
    %8 = arith.cmpi eq, %4, %7 : vector<8x48xi32>
    %9 = arith.extui %8 : vector<8x48xi1> to vector<8x48xi32>
    %10 = arith.sitofp %9 : vector<8x48xi32> to vector<8x48xf32>
    %cst = arith.constant dense<0.000000e+00> : vector<8x256xf32>
    %11 = tpu.matmul %10, %5, %cst {dimension_numbers = #tpu.dot_dimension_numbers<[1], [0], [0], [1], [0, 0, 1, 1], [], []>} : vector<8x48xf32>, vector<48x256xf32>, vector<8x256xf32> -> vector<8x256xf32>
    %12 = vector.extract_strided_slice %11 {offsets = [0, 0], sizes = [8, 128], strides = [1, 1]} : vector<8x256xf32> to vector<8x128xf32>
    %13 = vector.extract_strided_slice %11 {offsets = [0, 128], sizes = [8, 128], strides = [1, 1]} : vector<8x256xf32> to vector<8x128xf32>
    %14 = vector.extract_strided_slice %3 {offsets = [0, 1], sizes = [8, 1], strides = [1, 1]} : vector<8x4xi32> to vector<8x1xi32>
    %15 = vector.broadcast %14 : vector<8x1xi32> to vector<8x48xi32>
    %16 = arith.cmpi eq, %4, %15 : vector<8x48xi32>
    %17 = arith.extui %16 : vector<8x48xi1> to vector<8x48xi32>
    %18 = arith.sitofp %17 : vector<8x48xi32> to vector<8x48xf32>
    %cst_4 = arith.constant dense<0.000000e+00> : vector<8x256xf32>
    %19 = tpu.matmul %18, %5, %cst_4 {dimension_numbers = #tpu.dot_dimension_numbers<[1], [0], [0], [1], [0, 0, 1, 1], [], []>} : vector<8x48xf32>, vector<48x256xf32>, vector<8x256xf32> -> vector<8x256xf32>
    %20 = vector.extract_strided_slice %19 {offsets = [0, 0], sizes = [8, 128], strides = [1, 1]} : vector<8x256xf32> to vector<8x128xf32>
    %21 = vector.extract_strided_slice %19 {offsets = [0, 128], sizes = [8, 128], strides = [1, 1]} : vector<8x256xf32> to vector<8x128xf32>
    %22 = vector.extract_strided_slice %3 {offsets = [0, 2], sizes = [8, 1], strides = [1, 1]} : vector<8x4xi32> to vector<8x1xi32>
    %23 = vector.broadcast %22 : vector<8x1xi32> to vector<8x48xi32>
    %24 = arith.cmpi eq, %4, %23 : vector<8x48xi32>
    %25 = arith.extui %24 : vector<8x48xi1> to vector<8x48xi32>
    %26 = arith.sitofp %25 : vector<8x48xi32> to vector<8x48xf32>
    %cst_5 = arith.constant dense<0.000000e+00> : vector<8x256xf32>
    %27 = tpu.matmul %26, %5, %cst_5 {dimension_numbers = #tpu.dot_dimension_numbers<[1], [0], [0], [1], [0, 0, 1, 1], [], []>} : vector<8x48xf32>, vector<48x256xf32>, vector<8x256xf32> -> vector<8x256xf32>
    %28 = vector.extract_strided_slice %27 {offsets = [0, 0], sizes = [8, 128], strides = [1, 1]} : vector<8x256xf32> to vector<8x128xf32>
    %29 = vector.extract_strided_slice %27 {offsets = [0, 128], sizes = [8, 128], strides = [1, 1]} : vector<8x256xf32> to vector<8x128xf32>
    %30 = vector.extract_strided_slice %3 {offsets = [0, 3], sizes = [8, 1], strides = [1, 1]} : vector<8x4xi32> to vector<8x1xi32>
    %31 = vector.broadcast %30 : vector<8x1xi32> to vector<8x48xi32>
    %32 = arith.cmpi eq, %4, %31 : vector<8x48xi32>
    %33 = arith.extui %32 : vector<8x48xi1> to vector<8x48xi32>
    %34 = arith.sitofp %33 : vector<8x48xi32> to vector<8x48xf32>
    %cst_6 = arith.constant dense<0.000000e+00> : vector<8x256xf32>
    %35 = tpu.matmul %34, %5, %cst_6 {dimension_numbers = #tpu.dot_dimension_numbers<[1], [0], [0], [1], [0, 0, 1, 1], [], []>} : vector<8x48xf32>, vector<48x256xf32>, vector<8x256xf32> -> vector<8x256xf32>
    %36 = vector.extract_strided_slice %35 {offsets = [0, 0], sizes = [8, 128], strides = [1, 1]} : vector<8x256xf32> to vector<8x128xf32>
    %37 = vector.extract_strided_slice %35 {offsets = [0, 128], sizes = [8, 128], strides = [1, 1]} : vector<8x256xf32> to vector<8x128xf32>
    %c0_7 = arith.constant 0 : index
    %c0_8 = arith.constant 0 : index
    %38 = vector.load %arg3[%c0_7, %c0_8] : memref<8x128xf32, #tpu.memory_space<vmem>>, vector<8x128xf32>
    %39 = tpu.concatenate %38, %12, %20, %28, %36 in 1 : vector<8x128xf32>, vector<8x128xf32>, vector<8x128xf32>, vector<8x128xf32>, vector<8x128xf32> -> vector<8x640xf32>
    %40 = arith.truncf %39 : vector<8x640xf32> to vector<8x640xbf16>
    %c0_9 = arith.constant 0 : index
    %c0_10 = arith.constant 0 : index
    %41 = vector.load %arg4[%c0_9, %c0_10] : memref<640x896xbf16, #tpu.memory_space<vmem>>, vector<640x896xbf16>
    %cst_11 = arith.constant dense<0.000000e+00> : vector<8x896xf32>
    %42 = tpu.matmul %40, %41, %cst_11 {dimension_numbers = #tpu.dot_dimension_numbers<[1], [0], [0], [1], [0, 0, 1, 1], [], []>} : vector<8x640xbf16>, vector<640x896xbf16>, vector<8x896xf32> -> vector<8x896xf32>
    %c0_12 = arith.constant 0 : index
    %c0_13 = arith.constant 0 : index
    %43 = vector.load %arg5[%c0_12, %c0_13] : memref<1x896xf32, #tpu.memory_space<vmem>>, vector<1x896xf32>
    %44 = vector.broadcast %43 : vector<1x896xf32> to vector<8x896xf32>
    %45 = arith.addf %42, %44 : vector<8x896xf32>
    %46 = vector.extract_strided_slice %45 {offsets = [0, 0], sizes = [8, 128], strides = [1, 1]} : vector<8x896xf32> to vector<8x128xf32>
    %cst_14 = arith.constant 0.000000e+00 : f32
    %47 = vector.broadcast %cst_14 : f32 to vector<8x128xf32>
    %48 = arith.subf %47, %46 : vector<8x128xf32>
    %49 = math.exp %48 : vector<8x128xf32>
    %cst_15 = arith.constant 1.000000e+00 : f32
    %50 = vector.broadcast %cst_15 : f32 to vector<8x128xf32>
    %51 = arith.addf %50, %49 : vector<8x128xf32>
    %52 = tpu.reciprocal %51 {approx = true} : vector<8x128xf32> -> vector<8x128xf32>
    %53 = vector.extract_strided_slice %45 {offsets = [0, 128], sizes = [8, 128], strides = [1, 1]} : vector<8x896xf32> to vector<8x128xf32>
    %cst_16 = arith.constant 0.000000e+00 : f32
    %54 = vector.broadcast %cst_16 : f32 to vector<8x128xf32>
    %55 = arith.subf %54, %53 : vector<8x128xf32>
    %56 = math.exp %55 : vector<8x128xf32>
    %cst_17 = arith.constant 1.000000e+00 : f32
    %57 = vector.broadcast %cst_17 : f32 to vector<8x128xf32>
    %58 = arith.addf %57, %56 : vector<8x128xf32>
    %59 = tpu.reciprocal %58 {approx = true} : vector<8x128xf32> -> vector<8x128xf32>
    %60 = vector.extract_strided_slice %45 {offsets = [0, 256], sizes = [8, 128], strides = [1, 1]} : vector<8x896xf32> to vector<8x128xf32>
    %61 = math.tanh %60 : vector<8x128xf32>
    %62 = vector.extract_strided_slice %45 {offsets = [0, 384], sizes = [8, 128], strides = [1, 1]} : vector<8x896xf32> to vector<8x128xf32>
    %cst_18 = arith.constant 0.000000e+00 : f32
    %63 = vector.broadcast %cst_18 : f32 to vector<8x128xf32>
    %64 = arith.subf %63, %62 : vector<8x128xf32>
    %65 = math.exp %64 : vector<8x128xf32>
    %cst_19 = arith.constant 1.000000e+00 : f32
    %66 = vector.broadcast %cst_19 : f32 to vector<8x128xf32>
    %67 = arith.addf %66, %65 : vector<8x128xf32>
    %68 = tpu.reciprocal %67 {approx = true} : vector<8x128xf32> -> vector<8x128xf32>
    %69 = arith.mulf %68, %13 : vector<8x128xf32>
    %70 = vector.extract_strided_slice %45 {offsets = [0, 512], sizes = [8, 128], strides = [1, 1]} : vector<8x896xf32> to vector<8x128xf32>
    %cst_20 = arith.constant 0.000000e+00 : f32
    %71 = vector.broadcast %cst_20 : f32 to vector<8x128xf32>
    %72 = arith.subf %71, %70 : vector<8x128xf32>
    %73 = math.exp %72 : vector<8x128xf32>
    %cst_21 = arith.constant 1.000000e+00 : f32
    %74 = vector.broadcast %cst_21 : f32 to vector<8x128xf32>
    %75 = arith.addf %74, %73 : vector<8x128xf32>
    %76 = tpu.reciprocal %75 {approx = true} : vector<8x128xf32> -> vector<8x128xf32>
    %77 = arith.mulf %76, %21 : vector<8x128xf32>
    %78 = arith.addf %69, %77 : vector<8x128xf32>
    %79 = vector.extract_strided_slice %45 {offsets = [0, 640], sizes = [8, 128], strides = [1, 1]} : vector<8x896xf32> to vector<8x128xf32>
    %cst_22 = arith.constant 0.000000e+00 : f32
    %80 = vector.broadcast %cst_22 : f32 to vector<8x128xf32>
    %81 = arith.subf %80, %79 : vector<8x128xf32>
    %82 = math.exp %81 : vector<8x128xf32>
    %cst_23 = arith.constant 1.000000e+00 : f32
    %83 = vector.broadcast %cst_23 : f32 to vector<8x128xf32>
    %84 = arith.addf %83, %82 : vector<8x128xf32>
    %85 = tpu.reciprocal %84 {approx = true} : vector<8x128xf32> -> vector<8x128xf32>
    %86 = arith.mulf %85, %29 : vector<8x128xf32>
    %87 = arith.addf %78, %86 : vector<8x128xf32>
    %88 = vector.extract_strided_slice %45 {offsets = [0, 768], sizes = [8, 128], strides = [1, 1]} : vector<8x896xf32> to vector<8x128xf32>
    %cst_24 = arith.constant 0.000000e+00 : f32
    %89 = vector.broadcast %cst_24 : f32 to vector<8x128xf32>
    %90 = arith.subf %89, %88 : vector<8x128xf32>
    %91 = math.exp %90 : vector<8x128xf32>
    %cst_25 = arith.constant 1.000000e+00 : f32
    %92 = vector.broadcast %cst_25 : f32 to vector<8x128xf32>
    %93 = arith.addf %92, %91 : vector<8x128xf32>
    %94 = tpu.reciprocal %93 {approx = true} : vector<8x128xf32> -> vector<8x128xf32>
    %95 = arith.mulf %94, %37 : vector<8x128xf32>
    %96 = arith.addf %87, %95 : vector<8x128xf32>
    %97 = arith.mulf %52, %61 : vector<8x128xf32>
    %98 = arith.addf %97, %96 : vector<8x128xf32>
    %99 = math.tanh %98 : vector<8x128xf32>
    %100 = arith.mulf %59, %99 : vector<8x128xf32>
    %101 = tpu.iota {dimensions = array<i32: 0>} : vector<8x1xi32>
    %102 = arith.index_cast %arg0 : i32 to index
    %103 = memref.load %arg1[%102] : memref<5xi32, #tpu.memory_space<smem>>
    %104 = vector.broadcast %103 : i32 to vector<8x1xi32>
    %105 = arith.cmpi slt, %101, %104 : vector<8x1xi32>
    %106 = arith.extui %105 : vector<8x1xi1> to vector<8x1xi32>
    %107 = arith.sitofp %106 : vector<8x1xi32> to vector<8x1xf32>
    %108 = vector.broadcast %107 : vector<8x1xf32> to vector<8x128xf32>
    %109 = arith.mulf %100, %108 : vector<8x128xf32>
    %110 = vector.broadcast %107 : vector<8x1xf32> to vector<8x128xf32>
    %111 = arith.mulf %98, %110 : vector<8x128xf32>
    %112 = tpu.concatenate %109, %111 in 1 : vector<8x128xf32>, vector<8x128xf32> -> vector<8x256xf32>
    %c8_i32 = arith.constant 8 : i32
    %113 = arith.muli %arg0, %c8_i32 : i32
    %114 = tpu.assume_multiple %113, 8 : i32
    %115 = arith.index_cast %114 : i32 to index
    %c0_26 = arith.constant 0 : index
    %116 = vector.load %arg7[%115, %c0_26] : memref<48x256xf32, #tpu.memory_space<vmem>>, vector<8x256xf32>
    tpu.vector_store %arg7[%115, %c0_26], %112 {strides = array<i32>} : memref<48x256xf32, #tpu.memory_space<vmem>>, vector<8x256xf32>,
    return
  }
  func.func @transform_0(%arg0: i32, %arg1: memref<5xi32, #tpu.memory_space<smem>>) -> (i32, i32) {
    %c0_i32 = arith.constant 0 : i32
    %c0_i32_0 = arith.constant 0 : i32
    return %arg0, %c0_i32 : i32, i32
  }
  func.func @transform_1(%arg0: i32, %arg1: memref<5xi32, #tpu.memory_space<smem>>) -> (i32, i32) {
    %c0_i32 = arith.constant 0 : i32
    %c0_i32_0 = arith.constant 0 : i32
    return %arg0, %c0_i32 : i32, i32
  }
  func.func @transform_2(%arg0: i32, %arg1: memref<5xi32, #tpu.memory_space<smem>>) -> (i32, i32) {
    %c0_i32 = arith.constant 0 : i32
    %c0_i32_0 = arith.constant 0 : i32
    %c0_i32_1 = arith.constant 0 : i32
    return %c0_i32, %c0_i32_0 : i32, i32
  }
  func.func @transform_3(%arg0: i32, %arg1: memref<5xi32, #tpu.memory_space<smem>>) -> (i32, i32) {
    %c0_i32 = arith.constant 0 : i32
    %c0_i32_0 = arith.constant 0 : i32
    %c0_i32_1 = arith.constant 0 : i32
    return %c0_i32, %c0_i32_0 : i32, i32
  }
  func.func @transform_4(%arg0: i32, %arg1: memref<5xi32, #tpu.memory_space<smem>>) -> (i32, i32) {
    %c0_i32 = arith.constant 0 : i32
    %c0_i32_0 = arith.constant 0 : i32
    %c0_i32_1 = arith.constant 0 : i32
    return %c0_i32, %c0_i32_0 : i32, i32
  }
  func.func @transform_5(%arg0: i32, %arg1: memref<5xi32, #tpu.memory_space<smem>>) -> (i32, i32) {
    %c0_i32 = arith.constant 0 : i32
    %c0_i32_0 = arith.constant 0 : i32
    %c0_i32_1 = arith.constant 0 : i32
    return %c0_i32, %c0_i32_0 : i32, i32
  }
}

</mosaic_0001>

<bundles_post_ra>
// kernel: _run_tree_lstm.1
= control target key start
LH: loop header
LB: loop body
LE: loop exit
PB: predicated region body
PF: predicated region fallthrough
CT: control target
= control target key end

     0   :  { %s4198_s21 = smov [#allocation3]   ;;  %s4510_s0 = inlined_call_operand.hbm [shape: s32[5], index: 0, kind: input, shape index: {}]   ;;  %s4511_s1 = inlined_call_operand.vmem [shape: s32[40,4], index: 1, kind: input, shape index: {}]   ;;  %s4512_s2 = inlined_call_operand.hbm [shape: f32[40,128], index: 2, kind: input, shape index: {}]   ;;  %s4513_s3 = inlined_call_operand.hbm [shape: bf16[640,896], index: 3, kind: input, shape index: {}]   ;;  %s4514_s4 = inlined_call_operand.hbm [shape: f32[1,896], index: 4, kind: input, shape index: {}]   ;;  %s4515_s5 = inlined_call_operand.hbm [shape: f32[4,256], index: 5, kind: input, shape index: {}]   ;;  %s4516_s6 = inlined_call_operand.hbm [shape: f32[48,256], index: 6, kind: output, shape index: {}]  }
   0x1   :  { %12 = dma.hbm_to_smem %s4510_s0, 16, %s4198_s21, [#allocation2] }
   0x2   :  { %4164 = dma.done.wait [#allocation2], 16 }
   0x3   :  { %4165 = vsyncadd [#allocation2], 4294967280 }
   0x4   :  { %14 = sfence }
   0x5   :  { %15 = vsyncpa [#allocation5], 0 }
   0x6   :  { %17 = vsyncpa [#allocation5 + $0x1], 0 }
   0x7   :  { %18 = vsyncpa [#allocation8], 0 }
   0x8   :  { %19 = vsyncpa [#allocation11], 0 }
   0x9   :  { %20 = vsyncpa [#allocation6], 0  ;;  %s4253_s24 = smov 0   ;;  %s4255_s25 = smov 0  }
   0xa   :  { %s4257_s26 = smov 0   ;;  %s4259_s27 = smov 0  }
   0xb LB: > { %s4272_s0 = sadd.s32 4294967295, %s4196_s27   ;;  %p72_p0 = scmp.ne.s32.totalorder %s4188_s25, %s4184_s24  ;;  %s4196_s27 = sphi %s4259_s27, %s4534_s27   ;;  %s4192_s26 = sphi %s4257_s26, %s4533_s26   ;;  %s4188_s25 = sphi %s4255_s25, %s4532_s25   ;;  %s4184_s24 = sphi %s4253_s24, %s4531_s24  }
   0xc   : > { %p4517_p1 = scmp.eq.s32.totalorder %s4272_s0, 0  ;;  %p3103_p2 = scmp.ge.s32.totalorder %s4196_s27, 1 }
   0xd   : > { %p167_p3 = scmp.lt.s32.totalorder %s4196_s27, 6  ;;  %s4199_s30 = smov [#allocation7]  }
   0xe   : > { %p4281_p5 = por %p4517_p1, %p72_p0  ;;  %s179_s7 = sshll.u32 %s4199_s30, 4  ;;  %s180_s7 = int_to_ptr.vmem [resolvable:$true] %s179_s7 }
   0xf   : > { %p4285_p6 = pnand %p3103_p2, %p167_p3  ;;  %s4200_s9 = smov [#allocation9]  }
  0x10   : > { %s4520_s28 = scalar_select %p4281_p5, 1, 0 }
  0x11   : > { %s4521_s29 = scalar_select %p4285_p6, 1, 0 }
  0x12   : > { %p3505_p7 = pneg %p4285_p6  ;;  %s193_s10 = sshll.u32 %s4200_s9, 4  ;;  %s194_s10 = int_to_ptr.vmem [resolvable:$true] %s193_s10 }
  0x13   : > { %s4201_s11 = smov [#allocation10]   ;;  %s4029_s13 = scalar_lea.vmem %s180_s7, 35840 }
  0x14   : > { %p4293_p8 = pnand %p3505_p7, %p4517_p1  ;;  %s204_s12 = sshll.u32 %s4201_s11, 4  ;;  %s205_s12 = int_to_ptr.vmem [resolvable:$true] %s204_s12 }
  0x15   : > { %p4030_p10 = scmp.ne.s32.totalorder %s180_s7, %s4029_s13  ;;  %p4037_p13 = scmp.lt.s32.totalorder %s180_s7, %s180_s7 }
  0x16   : > { %p4020_p9 = pneg %p4293_p8  ;;  %p4038_p0 = scmp.lt.s32.totalorder %s4029_s13, %s4029_s13 }
  0x18   : > { %p4032_p11 = pnand %p4030_p10, %p4020_p9  ;;  %p4039_p2 = por %p4038_p0, %p4037_p13 }
  0x1a   : > { %p4033_p12 = pneg %p4032_p11 }
  0x1c   : > { %p4040_p3 = pnand %p4039_p2, %p4033_p12 }
  0x1e   : > { %4043 = shalt.err (!%p4040_p3)
}
  0x1f   : > { %s4202_s14 = smov 448   ;;  %s4203_s15 = smov 28  }
  0x20   : > { %3508 = dma.hbm_to_vmem [thread:$0]  (!%p4293_p8), %s4513_s3, 35840, %s180_s7, [#allocation8], %s4202_s14, %s4202_s14, %s4203_s15  }
  0x21   : > { %s4055_s18 = scalar_lea.vmem %s194_s10, 112  ;;  %s4062_s19 = scalar_lea.vmem %s194_s10, 128 }
  0x22   : > { %p4056_p7 = scmp.ne.s32.totalorder %s194_s10, %s4055_s18  ;;  %p4063_p4 = scmp.lt.s32.totalorder %s194_s10, %s194_s10 }
  0x23   : > { %p4064_p13 = scmp.lt.s32.totalorder %s4062_s19, %s4055_s18 }
  0x24   : > { %p4058_p10 = pnand %p4056_p7, %p4020_p9 }
  0x25   : > { %p4065_p12 = por %p4064_p13, %p4063_p4 }
  0x26   : > { %p4059_p11 = pneg %p4058_p10 }
  0x28   : > { %p4066_p0 = pnand %p4065_p12, %p4059_p11 }
  0x2a   : > { %4069 = shalt.err (!%p4066_p0)
}
  0x2b   : > { %3511 = dma.hbm_to_vmem [thread:$0]  (!%p4293_p8), %s4514_s4, 112, %s194_s10, [#allocation8]  }
  0x2c   : > { %s4081_s22 = scalar_lea.vmem %s205_s12, 128  ;;  %p4089_p10 = scmp.lt.s32.totalorder %s205_s12, %s205_s12 }
  0x2d   : > { %p4082_p2 = scmp.ne.s32.totalorder %s205_s12, %s4081_s22  ;;  %p4090_p1 = scmp.lt.s32.totalorder %s4081_s22, %s4081_s22 }
  0x2f   : > { %p4084_p3 = pnand %p4082_p2, %p4020_p9  ;;  %p4091_p5 = por %p4090_p1, %p4089_p10 }
  0x31   : > { %p4085_p7 = pneg %p4084_p3 }
  0x33   : > { %p4092_p4 = pnand %p4091_p5, %p4085_p7 }
  0x35   : > { %4095 = shalt.err (!%p4092_p4)
}
  0x36   : > { %3514 = dma.hbm_to_vmem [thread:$0]  (!%p4293_p8), %s4515_s5, 128, %s205_s12, [#allocation11]  }
  0x37   : > { %s4324_s30 = sadd.s32 1, %s4196_s27   ;;  %s59_s9 = sadd.s32 1, %s4192_s26 }
  0x38   : > { %s56_s7 = ssub.s32 %s4196_s27, %s4324_s30  ;;  %p66_p5 = scmp.ne.s32.totalorder %s4192_s26, %s4188_s25 }
  0x39   : > { %p57_p1 = scmp.eq.s32.totalorder %s56_s7, 0  ;;  %p67_p9 = scmp.eq.s32.totalorder %s4196_s27, 0 }
  0x3a   : > { %p3522_p11 = scmp.lt.s32.totalorder %s4196_s27, 5  ;;  %s222_s10 = sand.u32 1, %s4192_s26  }
  0x3b   : > { %s4334_s8 = scalar_select %p57_p1, %s4192_s26, %s59_s9  }
  0x3c   : > { %p68_p13 = por %p67_p9, %p66_p5  ;;  %s3108_s11 = sshll.u32 %s222_s10, 3 }
  0x3d   : > { %s3109_s13 = sshll.u32 %s4196_s27, 7  ;;  %s226_s12 = scalar_lea.vmem [#allocation4], %s3108_s11 }
  0x3e   : > { %s4341_s16 = scalar_lea.hbm %s4512_s2, %s3109_s13  ;;  %s233_s17 = sshll.u32 %s226_s12, 4  ;;  %s234_s17 = int_to_ptr.vmem [resolvable:$true] %s233_s17 }
  0x3f   : > { %p4343_p8 = pnand %p3522_p11, %p68_p13  ;;  %s223_s19 = scalar_lea.sflag [#allocation5], %s222_s10 }
  0x40   : > { %s4096_s20 = scalar_lea.hbm %s4341_s16, 128  ;;  %s4101_s22 = scalar_lea.hbm %s4512_s2, 640 }
  0x41   : > { %p4097_p12 = scmp.ne.s32.totalorder %s4341_s16, %s4096_s20  ;;  %p4098_p0 = pneg %p4343_p8 }
  0x42   : > { %p4102_p7 = scmp.lt.s32.totalorder %s4341_s16, %s4512_s2  ;;  %p4103_p10 = scmp.lt.s32.totalorder %s4101_s22, %s4096_s20 }
  0x43   : > { %p4099_p2 = pnand %p4098_p0, %p4097_p12 }
  0x44   : > { %p4104_p4 = por %p4103_p10, %p4102_p7 }
  0x45   : > { %p4100_p3 = pneg %p4099_p2 }
  0x47   : > { %p4105_p1 = pnand %p4104_p4, %p4100_p3 }
  0x49   : > { %4108 = shalt.err (!%p4105_p1)
}
  0x4a   : > { %s4109_s7 = scalar_lea.vmem %s234_s17, 128  ;;  %s4204_s9 = smov [#allocation4]  }
  0x4b   : > { %p4110_p5 = scmp.ne.s32.totalorder %s234_s17, %s4109_s7  ;;  %s4114_s10 = sshll.u32 %s4204_s9, 4  ;;  %s4115_s10 = int_to_ptr.vmem [resolvable:$false] %s4114_s10 }
  0x4c   : > { %s4116_s11 = scalar_lea.vmem %s4115_s10, 256  ;;  %p4117_p13 = scmp.lt.s32.totalorder %s234_s17, %s4115_s10 }
  0x4d   : > { %p4112_p9 = pnand %p4110_p5, %p4098_p0  ;;  %p4118_p12 = scmp.lt.s32.totalorder %s4116_s11, %s4109_s7 }
  0x4f   : > { %p4113_p11 = pneg %p4112_p9  ;;  %p4119_p2 = por %p4118_p12, %p4117_p13 }
  0x51   : > { %p4120_p6 = pnand %p4119_p2, %p4113_p11 }
  0x53   : > { %4123 = shalt.err (!%p4120_p6)
}
  0x54   : > { %3518 = dma.hbm_to_vmem [thread:$0]  (!%p4343_p8), %s4341_s16, 128, %s234_s17, %s223_s19  }
  0x55   : > { %p4524_p3 = scmp.ne.s32.totalorder %s4521_s29, 0 }
  0x56   : > { %s244_s13 = sand.u32 (!%p4524_p3), 1, %s4188_s25   ;;  %p4525_p0 = scmp.ne.s32.totalorder (!%p4524_p3), %s4520_s28, 0 }
  0x57   : > { %242 = sbr.rel (%p4524_p3) target bundleno = 934 (0x3a6), region = 40  ;;  %s4364_s14 = sshll.u32 (!%p4524_p3), %s244_s13, 3 }
  0x58   : > { %s245_s15 = scalar_lea.sflag (!%p4524_p3), [#allocation5], %s244_s13  ;;  %s248_s12 = scalar_lea.vmem (!%p4524_p3), [#allocation4], %s4364_s14 }
  0x5c   : > { %4167 = dma.done.wait (%p4525_p0), %s245_s15, 128  }
  0x5d   : > { %4169 = vsyncadd (%p4525_p0), %s245_s15, 4294967168  ;;  %p4526_p6 = scmp.eq.s32.totalorder %s4272_s0, 0 }
  0x5f   : > { %4171 = dma.done.wait (%p4526_p6), [#allocation8], 35952   ;;  %p4527_p8 = pmov %p4526_p6 }
  0x60   : > { %p4528_p7 = pmov %p4526_p6 }
  0x61   : > { %4173 = vsyncadd (%p4527_p8), [#allocation8], 4294931344 }
  0x62   : > { %4175 = dma.done.wait (%p4528_p7), [#allocation11], 128   ;;  %p4529_p10 = pmov %p4526_p6 }
  0x63   : > { %p286_p4 = scmp.lt.s32.totalorder %s4272_s0, 4  ;;  %p4530_p1 = scmp.ne.s32.totalorder %s4272_s0, 0 }
  0x64   : > { %4177 = vsyncadd (%p4529_p10), [#allocation11], 4294967168 }
  0x65   : > { %s287_s29 = scalar_select %p286_p4, %s4272_s0, 4 }
  0x66   : > { %294 = sbr.rel (%p4530_p1) target bundleno = 115 (0x73), region = 60 }
  0x67   : > { %s3115_s16 = sshll.u32 %s287_s29, 3 }
  0x68   : > { %s289_s18 = scalar_lea.vmem %s4511_s1, %s3115_s16 }
  0x6b   : > { %v307_v0 = vld [vmem:[#allocation10] sm:$0xff]  ;;  %v4205_v1 = vmov 0.0  }
  0x6c   : > { %305 = vst [vmem:[#allocation12 + $0x50] sm:$0xff] %v4205_v1  ;;  %295 = vst [vmem:[#allocation12] sm:$0xff] %v4205_v1  ;;  %v309_v2 = vcombine.high %v307_v0, %v307_v0 }
  0x6d   : > { %296 = vst [vmem:[#allocation12 + $0x8] sm:$0xff] %v4205_v1  ;;  %297 = vst [vmem:[#allocation12 + $0x10] sm:$0xff] %v4205_v1 }
  0x6e   : > { %298 = vst [vmem:[#allocation12 + $0x18] sm:$0xff] %v4205_v1  ;;  %299 = vst [vmem:[#allocation12 + $0x20] sm:$0xff] %v4205_v1 }
  0x6f   : > { %300 = vst [vmem:[#allocation12 + $0x28] sm:$0xff] %v4205_v1  ;;  %301 = vst [vmem:[#allocation12 + $0x30] sm:$0xff] %v4205_v1 }
  0x70   : > { %302 = vst [vmem:[#allocation12 + $0x38] sm:$0xff] %v4205_v1  ;;  %303 = vst [vmem:[#allocation12 + $0x40] sm:$0xff] %v4205_v1 }
  0x71   : > { %304 = vst [vmem:[#allocation12 + $0x48] sm:$0xff] %v4205_v1  ;;  %306 = vst [vmem:[#allocation12 + $0x58] sm:$0xff] %v4205_v1 }
  0x72   : > { %311 = vst [vmem:[#allocation12 + $0x50] sm:$0xf] %v307_v0  ;;  %312 = vst [vmem:[#allocation12 + $0x58] sm:$0xf] %v309_v2 }
  0x73 PF: > { %v313_v3 = vld [vmem:[%s289_s18] sm:$0xff]  ;;  %v4206_v5 = vmov 0   ;;  %v4207_v6 = vmov 1   ;;  %v4208_v11 = vmov 0.0   ;;  %v4209_v13 = vmov 2   ;;  %s2985_s19 = sld [smem:[#allocation3 + %s4272_s0]] }
  0x74   : > { %3577 = vset.pattern.permute.xlu0 %v4206_v5  ;;  %3579 = vset.pattern.permute.xlu1 %v4207_v6  ;;  %v4210_v14 = vmov 3   ;;  %v318_v18 = vld [vmem:[#allocation12 + $0x10] sm:$0xff]  ;;  %v317_v19 = vld [vmem:[#allocation12 + $0x8] sm:$0xff]  ;;  %v316_v20 = vld [vmem:[#allocation12] sm:$0xff]  ;;  %v314_v21 = vlaneseq  ;;  %vm334_vm0 = vcmask 392192   ;;  %vm4211_vm5 = vmmov 0  }
  0x75   : > { %329 = vperm.xlu0 %3577, %v313_v3   ;;  %410 = vperm.xlu1 %3579, %v313_v3   ;;  %v320_v16 = vld [vmem:[#allocation12 + $0x20] sm:$0xff]  ;;  %v319_v17 = vld [vmem:[#allocation12 + $0x18] sm:$0xff]  ;;  %v3590_v38 = vld [vmem:[#allocation7 + $0x11c] ss:$28 sps:$4 sm:$0xff]   ;;  %s3406_s20 = sshll.u32 %s4272_s0, 3  ;;  %s4212_s23 = smov [#allocation12]  }
  0x76   : > { %402 = vmatprep.mubr.f32.mxu0 %v4208_v11  ;;  %v322_v12 = vld [vmem:[#allocation12 + $0x30] sm:$0xff]  ;;  %v321_v15 = vld [vmem:[#allocation12 + $0x28] sm:$0xff]  ;;  %482 = vmatprep.mubr.f32.mxu1 %v4208_v11  ;;  %v315_v22 = vand.u32 127, %v314_v21  ;;  %v3584_v30 = vld [vmem:[#allocation7 + $0x18c] ss:$28 sps:$4 sm:$0xff]   ;;  %s2993_s27 = sshra.s32 %s3406_s20, 3 }
  0x77   : > { %v324_v9 = vld [vmem:[#allocation12 + $0x40] sm:$0xff]  ;;  %v323_v10 = vld [vmem:[#allocation12 + $0x38] sm:$0xff]  ;;  %v3605_v40 = vld [vmem:[#allocation7 + $0x49c] ss:$28 sps:$4 sm:$0xff]   ;;  %s3413_s21 = sshll.u32 %s2993_s27, 4  ;;  %s3006_s24 = sshll.u32 %s4212_s23, 4  ;;  %s3007_s24 = int_to_ptr.vmem [resolvable:$true] %s3006_s24 }
  0x78   : > { %v325_v8 = vld [vmem:[#allocation12 + $0x48] sm:$0xff]  ;;  %v3582_v31 = vld [vmem:[#allocation7 + $0x188] ss:$28 sps:$4 sm:$0xff]   ;;  %v3587_v33 = vld [vmem:[#allocation7 + $0x154] ss:$28 sps:$4 sm:$0xff]   ;;  %s2997_s22 = scalar_lea.vmem [#allocation12], %s3413_s21  ;;  %p4131_p12 = scmp.lt.s32.totalorder %s3007_s24, %s3007_s24 }
  0x79   : > { %v327_v4 = vld [vmem:[#allocation12 + $0x58] sm:$0xff]  ;;  %v326_v7 = vld [vmem:[#allocation12 + $0x50] sm:$0xff]  ;;  %3578 = vset.pattern.permute.xlu0 %v4209_v13  ;;  %3580 = vset.pattern.permute.xlu1 %v4210_v14  ;;  %v3599_v36 = vld [vmem:[#allocation7 + $0x4d4] ss:$28 sps:$4 sm:$0xff]   ;;  %p3526_p5 = scmp.eq.s32.totalorder %s4272_s0, 4  ;;  %s4124_s7 = scalar_lea.vmem %s3007_s24, 1536 }
  0x7a   : > { %358 = vmatprep.subr.mxu0 %v327_v4  ;;  %438 = vmatprep.subr.mxu1 %v327_v4  ;;  %v3593_v34 = vld [vmem:[#allocation7 + $0x50c] ss:$28 sps:$4 sm:$0xff]   ;;  %v3588_v41 = vld [vmem:[#allocation7 + $0x118] ss:$28 sps:$4 sm:$0xff]   ;;  %v3596_v42 = vld [vmem:[#allocation7 + $0xe4] ss:$28 sps:$4 sm:$0xff]   ;;  %p4125_p9 = scmp.ne.s32.totalorder %s3007_s24, %s4124_s7  ;;  %p4132_p2 = scmp.lt.s32.totalorder %s4124_s7, %s4124_s7 }
  0x7b   : > { %359 = vmatpush1.msra.mxu0 %v326_v7  ;;  %439 = vmatpush1.msra.mxu1 %v326_v7  ;;  %v3591_v35 = vld [vmem:[#allocation7 + $0x508] ss:$28 sps:$4 sm:$0xff]   ;;  %v3585_v37 = vld [vmem:[#allocation7 + $0x150] ss:$28 sps:$4 sm:$0xff]   ;;  %v3603_v43 = vld [vmem:[#allocation7 + $0x498] ss:$28 sps:$4 sm:$0xff]  }
  0x7c   : > { %360 = vmatprep.subr.mxu0 %v325_v8  ;;  %490 = vperm.xlu0 %3578, %v313_v3   ;;  %v3597_v39 = vld [vmem:[#allocation7 + $0x4d0] ss:$28 sps:$4 sm:$0xff]   ;;  %v3611_v44 = vld [vmem:[#allocation7 + $0x464] ss:$28 sps:$4 sm:$0xff]   ;;  %v3614_v54 = vld [vmem:[#allocation7 + $0x3c] ss:$28 sps:$4 sm:$0xff]   ;;  %p4126_p11 = pnand %p4125_p9, %p3526_p5  ;;  %p4133_p3 = por %p4132_p2, %p4131_p12 }
  0x7d   : > { %570 = vperm.xlu1 %3580, %v313_v3   ;;  %361 = vmatpush1.msra.mxu0 %v324_v9  ;;  %v3594_v45 = vld [vmem:[#allocation7 + $0xe0] ss:$28 sps:$4 sm:$0xff]   ;;  %v3602_v46 = vld [vmem:[#allocation7 + $0xac] ss:$28 sps:$4 sm:$0xff]   ;;  %v3608_v50 = vld [vmem:[#allocation7 + $0x74] ss:$28 sps:$4 sm:$0xff]  }
  0x7e   : > { %440 = vmatprep.subr.mxu1 %v325_v8  ;;  %362 = vmatprep.subr.mxu0 %v323_v10  ;;  %v3609_v47 = vld [vmem:[#allocation7 + $0x460] ss:$28 sps:$4 sm:$0xff]   ;;  %v3617_v48 = vld [vmem:[#allocation7 + $0x42c] ss:$28 sps:$4 sm:$0xff]   ;;  %v3623_v52 = vld [vmem:[#allocation7 + $0x3f4] ss:$28 sps:$4 sm:$0xff]   ;;  %p4127_p13 = pneg %p4126_p11 }
  0x7f   : > { %441 = vmatpush1.msra.mxu1 %v324_v9  ;;  %363 = vmatpush1.msra.mxu0 %v322_v12  ;;  %v3600_v49 = vld [vmem:[#allocation7 + $0xa8] ss:$28 sps:$4 sm:$0xff]   ;;  %v3606_v53 = vld [vmem:[#allocation7 + $0x70] ss:$28 sps:$4 sm:$0xff]   ;;  %v3629_v56 = vld [vmem:[#allocation7 + $0x3bc] ss:$28 sps:$4 sm:$0xff]  }
  0x80   : > { %442 = vmatprep.subr.mxu1 %v323_v10  ;;  %364 = vmatprep.subr.mxu0 %v321_v15  ;;  %v3615_v51 = vld [vmem:[#allocation7 + $0x428] ss:$28 sps:$4 sm:$0xff]   ;;  %v3621_v55 = vld [vmem:[#allocation7 + $0x3f0] ss:$28 sps:$4 sm:$0xff]   ;;  %v3612_v57 = vld [vmem:[#allocation7 + $0x38] ss:$28 sps:$4 sm:$0xff]   ;;  %p4134_p0 = pnand %p4133_p3, %p4127_p13 }
  0x81   : > { %443 = vmatpush1.msra.mxu1 %v322_v12  ;;  %365 = vmatpush1.msra.mxu0 %v320_v16  ;;  %v3620_v58 = vld [vmem:[#allocation7 + $0x4] ss:$28 sps:$4 sm:$0xff]   ;;  %v3627_v59 = vld [vmem:[#allocation7 + $0x3b8] ss:$28 sps:$4 sm:$0xff]   ;;  %v3626_v62 = vld [vmem:[#allocation7 + $0x34c] ss:$28 sps:$4 sm:$0xff]  }
  0x82   : > { %444 = vmatprep.subr.mxu1 %v321_v15  ;;  %366 = vmatprep.subr.mxu0 %v319_v17  ;;  %v3635_v60 = vld [vmem:[#allocation7 + $0x384] ss:$28 sps:$4 sm:$0xff]   ;;  %v3641_v0 = vld [vmem:[#allocation7 + $0x6cc] ss:$28 sps:$4 sm:$0xff]   ;;  %v3632_v2 = vld [vmem:[#allocation7 + $0x314] ss:$28 sps:$4 sm:$0xff]  }
  0x83   : > { %445 = vmatpush1.msra.mxu1 %v320_v16  ;;  %367 = vmatpush1.msra.mxu0 %v318_v18  ;;  %v3618_v61 = vld [vmem:[#allocation7] ss:$28 sps:$4 sm:$0xff]   ;;  %v3624_v1 = vld [vmem:[#allocation7 + $0x348] ss:$28 sps:$4 sm:$0xff]   ;;  %v3630_v6 = vld [vmem:[#allocation7 + $0x310] ss:$28 sps:$4 sm:$0xff]  }
  0x84   : > { %446 = vmatprep.subr.mxu1 %v319_v17  ;;  %368 = vmatprep.subr.mxu0 %v317_v19  ;;  %v3633_v63 = vld [vmem:[#allocation7 + $0x380] ss:$28 sps:$4 sm:$0xff]   ;;  %v3639_v3 = vld [vmem:[#allocation7 + $0x6c8] ss:$28 sps:$4 sm:$0xff]   ;;  %v3651_v13 = vld [vmem:[#allocation7 + $0x658] ss:$28 sps:$4 sm:$0xff]  }
  0x85   : > { %447 = vmatpush1.msra.mxu1 %v318_v18  ;;  %369 = vmatpush1.msra.mxu0 %v316_v20 }
  0x86   : > { %448 = vmatprep.subr.mxu1 %v317_v19  ;;  %518 = vmatprep.subr.mxu0 %v327_v4 }
  0x87   : > { %449 = vmatpush1.msra.mxu1 %v316_v20  ;;  %3581 = vset.pattern.permute.xlu0 %v4210_v14  ;;  %v3659_v14 = vld [vmem:[#allocation7 + $0x624] ss:$28 sps:$4 sm:$0xff]  }
  0x88   : > { %598 = vmatprep.subr.mxu1 %v327_v4  ;;  %v3647_v4 = vld [vmem:[#allocation7 + $0x694] ss:$28 sps:$4 sm:$0xff]  }
  0xf0   : > { %v330_v23 = vpop.permute.xlu0 %329  ;;  %v411_v24 = vpop.permute.xlu1 %410 }
  0xf1   : > { %vm331_vm1 = vcmp.eq.s32.totalorder %v315_v22, %v330_v23  ;;  %vm412_vm2 = vcmp.eq.s32.totalorder %v315_v22, %v411_v24  ;;  %v3654_v23 = vld [vmem:[#allocation7 + $0x230] ss:$28 sps:$4 sm:$0xff]   ;;  %v3662_v24 = vld [vmem:[#allocation7 + $0x1fc] ss:$28 sps:$4 sm:$0xff]  }
  0xf2   : > { %v3117_v25 = vsel %vm331_vm1, 1.0, %v4208_v11  ;;  %v3119_v26 = vsel %vm412_vm2, 1.0, %v4208_v11 }
  0xf3   : > { %3118 = vmatmul.mubr.msk.f32.vlgmr.msra.gmra.mxu0 %vm334_vm0, %v3117_v25  ;;  %3120 = vmatmul.mubr.msk.f32.vlgmr.msra.gmra.mxu1 %vm334_vm0, %v3119_v26  ;;  %v3671_v25 = vld [vmem:[#allocation7 + $0x5b4] ss:$28 sps:$4 sm:$0xff]  }
  0xf4   : > { %519 = vmatpush1.msra.mxu0 %v326_v7  ;;  %562 = vmatprep.mubr.f32.mxu0 %v4208_v11  ;;  %v3660_v26 = vld [vmem:[#allocation7 + $0x1f8] ss:$28 sps:$4 sm:$0xff]  }
  0xf5   : > { %520 = vmatprep.subr.mxu0 %v325_v8  ;;  %599 = vmatpush1.msra.mxu1 %v326_v7  ;;  %v3638_v7 = vld [vmem:[#allocation7 + $0x2dc] ss:$28 sps:$4 sm:$0xff]  }
  0xf6   : > { %521 = vmatpush1.msra.mxu0 %v324_v9  ;;  %600 = vmatprep.subr.mxu1 %v325_v8  ;;  %v3645_v8 = vld [vmem:[#allocation7 + $0x690] ss:$28 sps:$4 sm:$0xff]  }
  0xf7   : > { %v491_v27 = vpop.permute.xlu0 %490  ;;  %522 = vmatprep.subr.mxu0 %v323_v10  ;;  %601 = vmatpush1.msra.mxu1 %v324_v9  ;;  %v3653_v9 = vld [vmem:[#allocation7 + $0x65c] ss:$28 sps:$4 sm:$0xff]  }
  0xf8   : > { %523 = vmatpush1.msra.mxu0 %v322_v12  ;;  %602 = vmatprep.subr.mxu1 %v323_v10  ;;  %v571_v28 = vpop.permute.xlu1 %570  ;;  %vm492_vm3 = vcmp.eq.s32.totalorder %v315_v22, %v491_v27  ;;  %v3636_v10 = vld [vmem:[#allocation7 + $0x2d8] ss:$28 sps:$4 sm:$0xff]   ;;  %v3669_v27 = vld [vmem:[#allocation7 + $0x5b0] ss:$28 sps:$4 sm:$0xff]  }
  0xf9   : > { %524 = vmatprep.subr.mxu0 %v321_v15  ;;  %603 = vmatpush1.msra.mxu1 %v322_v12  ;;  %vm572_vm4 = vcmp.eq.s32.totalorder %v315_v22, %v571_v28  ;;  %v3121_v29 = vsel %vm492_vm3, 1.0, %v4208_v11  ;;  %v3644_v12 = vld [vmem:[#allocation7 + $0x2a4] ss:$28 sps:$4 sm:$0xff]  }
  0xfa   : > { %525 = vmatpush1.msra.mxu0 %v320_v16  ;;  %604 = vmatprep.subr.mxu1 %v321_v15  ;;  %v3123_v32 = vsel %vm572_vm4, 1.0, %v4208_v11  ;;  %v3642_v15 = vld [vmem:[#allocation7 + $0x2a0] ss:$28 sps:$4 sm:$0xff]   ;;  %v3663_v22 = vld [vmem:[#allocation7 + $0x5e8] ss:$28 sps:$4 sm:$0xff]  }
  0xfb   : > { %526 = vmatprep.subr.mxu0 %v319_v17  ;;  %605 = vmatpush1.msra.mxu1 %v320_v16  ;;  %v3650_v16 = vld [vmem:[#allocation7 + $0x26c] ss:$28 sps:$4 sm:$0xff]   ;;  %v3668_v28 = vld [vmem:[#allocation7 + $0x1c4] ss:$28 sps:$4 sm:$0xff]  }
  0xfc   : > { %527 = vmatpush1.msra.mxu0 %v318_v18  ;;  %606 = vmatprep.subr.mxu1 %v319_v17  ;;  %v3657_v17 = vld [vmem:[#allocation7 + $0x620] ss:$28 sps:$4 sm:$0xff]  }
  0xfd   : > { %528 = vmatprep.subr.mxu0 %v317_v19  ;;  %607 = vmatpush1.msra.mxu1 %v318_v18  ;;  %v3665_v18 = vld [vmem:[#allocation7 + $0x5ec] ss:$28 sps:$4 sm:$0xff]  }
  0xfe   : > { %529 = vmatpush1.msra.mxu0 %v316_v20  ;;  %608 = vmatprep.subr.mxu1 %v317_v19  ;;  %v3648_v19 = vld [vmem:[#allocation7 + $0x268] ss:$28 sps:$4 sm:$0xff]  }
  0xff   : > { %3122 = vmatmul.mubr.msk.f32.vlgmr.msra.gmra.mxu0 %vm334_vm0, %v3121_v29  ;;  %609 = vmatpush1.msra.mxu1 %v316_v20  ;;  %v3656_v20 = vld [vmem:[#allocation7 + $0x234] ss:$28 sps:$4 sm:$0xff]  }
 0x100   : > { %642 = vmatprep.mubr.f32.mxu1 %v4208_v11  ;;  %2452 = vmatprep.subr.bf16.mxu0 %v3584_v30  ;;  %v3675_v29 = vld [vmem:[#allocation7 + $0x578] ss:$28 sps:$4 sm:$0xff]  }
 0x101   : > { %3124 = vmatmul.mubr.msk.f32.vlgmr.msra.gmra.mxu1 %vm334_vm0, %v3123_v32  ;;  %2453 = vmatpush1.bf16.msra.mxu0 %v3582_v31  ;;  %v3677_v30 = vld [vmem:[#allocation7 + $0x57c] ss:$28 sps:$4 sm:$0xff]   ;;  %v3674_v32 = vld [vmem:[#allocation7 + $0x88c] ss:$28 sps:$4 sm:$0xff]  }
 0x102   : > { %2454 = vmatprep.subr.bf16.mxu0 %v3587_v33  ;;  %2493 = vmatprep.subr.bf16.mxu1 %v3593_v34  ;;  %v3666_v31 = vld [vmem:[#allocation7 + $0x1c0] ss:$28 sps:$4 sm:$0xff]  }
 0x103   : > { %2494 = vmatpush1.bf16.msra.mxu1 %v3591_v35  ;;  %v3681_v33 = vld [vmem:[#allocation7 + $0x540] ss:$28 sps:$4 sm:$0xff]   ;;  %v3689_v35 = vld [vmem:[#allocation7 + $0x194] ss:$28 sps:$4 sm:$0xff]  }
 0x104   : > { %2495 = vmatprep.subr.bf16.mxu1 %v3599_v36  ;;  %v3683_v34 = vld [vmem:[#allocation7 + $0x544] ss:$28 sps:$4 sm:$0xff]   ;;  %v649_v36 = vld [vmem:[%s248_s12] sm:$0xff] }
 0x105   : > { %2455 = vmatpush1.bf16.msra.mxu0 %v3585_v37 }
 0x106   : > { %2456 = vmatprep.subr.bf16.mxu0 %v3590_v38  ;;  %v4402_v38 = vpack.c.bf16 %v649_v36, %v649_v36  ;;  %v3758_v36 = vld [vmem:[#allocation7 + $0x3c4] ss:$28 sps:$4 sm:$0xff]  }
 0x107   : > { %2496 = vmatpush1.bf16.msra.mxu1 %v3597_v39 }
 0x108   : > { %2497 = vmatprep.subr.bf16.mxu1 %v3605_v40  ;;  %v3672_v40 = vld [vmem:[#allocation7 + $0x888] ss:$28 sps:$4 sm:$0xff]  }
 0x109   : > { %2457 = vmatpush1.bf16.msra.mxu0 %v3588_v41  ;;  %v3680_v41 = vld [vmem:[#allocation7 + $0x854] ss:$28 sps:$4 sm:$0xff]  }
 0x10a   : > { %2458 = vmatprep.subr.bf16.mxu0 %v3596_v42  ;;  %v3678_v42 = vld [vmem:[#allocation7 + $0x850] ss:$28 sps:$4 sm:$0xff]  }
 0x10b   : > { %2498 = vmatpush1.bf16.msra.mxu1 %v3603_v43  ;;  %v3686_v43 = vld [vmem:[#allocation7 + $0x81c] ss:$28 sps:$4 sm:$0xff]  }
 0x10c   : > { %2499 = vmatprep.subr.bf16.mxu1 %v3611_v44  ;;  %v3684_v44 = vld [vmem:[#allocation7 + $0x818] ss:$28 sps:$4 sm:$0xff]  }
 0x10d   : > { %2459 = vmatpush1.bf16.msra.mxu0 %v3594_v45 }
 0x10e   : > { %2460 = vmatprep.subr.bf16.mxu0 %v3602_v46  ;;  %v3692_v46 = vld [vmem:[#allocation7 + $0x7e4] ss:$28 sps:$4 sm:$0xff]  }
 0x10f   : > { %2500 = vmatpush1.bf16.msra.mxu1 %v3609_v47 }
 0x110   : > { %2501 = vmatprep.subr.bf16.mxu1 %v3617_v48 }
 0x111   : > { %2461 = vmatpush1.bf16.msra.mxu0 %v3600_v49 }
 0x112   : > { %2462 = vmatprep.subr.bf16.mxu0 %v3608_v50 }
 0x113   : > { %2502 = vmatpush1.bf16.msra.mxu1 %v3615_v51  ;;  %v3687_v51 = vld [vmem:[#allocation7 + $0x190] ss:$28 sps:$4 sm:$0xff]  }
 0x114   : > { %2503 = vmatprep.subr.bf16.mxu1 %v3623_v52  ;;  %v3690_v52 = vld [vmem:[#allocation7 + $0x7e0] ss:$28 sps:$4 sm:$0xff]  }
 0x115   : > { %2463 = vmatpush1.bf16.msra.mxu0 %v3606_v53  ;;  %v3695_v53 = vld [vmem:[#allocation7 + $0x15c] ss:$28 sps:$4 sm:$0xff]  }
 0x116   : > { %2464 = vmatprep.subr.bf16.mxu0 %v3614_v54  ;;  %v3698_v54 = vld [vmem:[#allocation7 + $0x7ac] ss:$28 sps:$4 sm:$0xff]  }
 0x117   : > { %2504 = vmatpush1.bf16.msra.mxu1 %v3621_v55  ;;  %v3693_v55 = vld [vmem:[#allocation7 + $0x158] ss:$28 sps:$4 sm:$0xff]  }
 0x118   : > { %2505 = vmatprep.subr.bf16.mxu1 %v3629_v56  ;;  %v3696_v56 = vld [vmem:[#allocation7 + $0x7a8] ss:$28 sps:$4 sm:$0xff]  }
 0x119   : > { %2465 = vmatpush1.bf16.msra.mxu0 %v3612_v57  ;;  %v3701_v57 = vld [vmem:[#allocation7 + $0x124] ss:$28 sps:$4 sm:$0xff]  }
 0x11a   : > { %2466 = vmatprep.subr.bf16.mxu0 %v3620_v58  ;;  %v3704_v58 = vld [vmem:[#allocation7 + $0x774] ss:$28 sps:$4 sm:$0xff]  }
 0x11b   : > { %2506 = vmatpush1.bf16.msra.mxu1 %v3627_v59  ;;  %v3699_v59 = vld [vmem:[#allocation7 + $0x120] ss:$28 sps:$4 sm:$0xff]  }
 0x11c   : > { %2507 = vmatprep.subr.bf16.mxu1 %v3635_v60  ;;  %v3702_v60 = vld [vmem:[#allocation7 + $0x770] ss:$28 sps:$4 sm:$0xff]  }
 0x11d   : > { %2467 = vmatpush1.bf16.msra.mxu0 %v3618_v61  ;;  %v3707_v61 = vld [vmem:[#allocation7 + $0xec] ss:$28 sps:$4 sm:$0xff]  }
 0x11e   : > { %2468 = vmatprep.subr.bf16.mxu0 %v3626_v62  ;;  %v3710_v62 = vld [vmem:[#allocation7 + $0x73c] ss:$28 sps:$4 sm:$0xff]  }
 0x11f   : > { %2508 = vmatpush1.bf16.msra.mxu1 %v3633_v63  ;;  %v3705_v63 = vld [vmem:[#allocation7 + $0xe8] ss:$28 sps:$4 sm:$0xff]  }
 0x120   : > { %2509 = vmatprep.subr.bf16.mxu1 %v3641_v0  ;;  %v3708_v0 = vld [vmem:[#allocation7 + $0x738] ss:$28 sps:$4 sm:$0xff]  }
 0x121   : > { %2469 = vmatpush2.bf16.msra.mxu0 %v3624_v1  ;;  %v3713_v1 = vld [vmem:[#allocation7 + $0xb4] ss:$28 sps:$4 sm:$0xff]  }
 0x122   : > { %2470 = vmatprep.subr.bf16.mxu0 %v3632_v2  ;;  %v3716_v2 = vld [vmem:[#allocation7 + $0x704] ss:$28 sps:$4 sm:$0xff]  }
 0x123   : > { %2510 = vmatpush2.bf16.msra.mxu1 %v3639_v3 }
 0x124   : > { %2511 = vmatprep.subr.bf16.mxu1 %v3647_v4  ;;  %v3711_v4 = vld [vmem:[#allocation7 + $0xb0] ss:$28 sps:$4 sm:$0xff]  }
 0x125   : > { %2471 = vmatpush2.bf16.msra.mxu0 %v3630_v6  ;;  %v3714_v6 = vld [vmem:[#allocation7 + $0x700] ss:$28 sps:$4 sm:$0xff]  }
 0x126   : > { %2472 = vmatprep.subr.bf16.mxu0 %v3638_v7 }
 0x127   : > { %2512 = vmatpush2.bf16.msra.mxu1 %v3645_v8  ;;  %v3719_v8 = vld [vmem:[#allocation7 + $0x7c] ss:$28 sps:$4 sm:$0xff]  }
 0x128   : > { %2513 = vmatprep.subr.bf16.mxu1 %v3653_v9  ;;  %v3722_v9 = vld [vmem:[#allocation7 + $0x514] ss:$28 sps:$4 sm:$0xff]  }
 0x129   : > { %2473 = vmatpush2.bf16.msra.mxu0 %v3636_v10 }
 0x12a   : > { %2474 = vmatprep.subr.bf16.mxu0 %v3644_v12  ;;  %v3717_v12 = vld [vmem:[#allocation7 + $0x78] ss:$28 sps:$4 sm:$0xff]  }
 0x12b   : > { %2514 = vmatpush2.bf16.msra.mxu1 %v3651_v13  ;;  %v3720_v13 = vld [vmem:[#allocation7 + $0x510] ss:$28 sps:$4 sm:$0xff]  }
 0x12c   : > { %2515 = vmatprep.subr.bf16.mxu1 %v3659_v14  ;;  %v3725_v14 = vld [vmem:[#allocation7 + $0x44] ss:$28 sps:$4 sm:$0xff]  }
 0x12d   : > { %2475 = vmatpush2.bf16.msra.mxu0 %v3642_v15  ;;  %v3728_v15 = vld [vmem:[#allocation7 + $0x4dc] ss:$28 sps:$4 sm:$0xff]  }
 0x12e   : > { %2476 = vmatprep.subr.bf16.mxu0 %v3650_v16  ;;  %v3723_v16 = vld [vmem:[#allocation7 + $0x40] ss:$28 sps:$4 sm:$0xff]  }
 0x12f   : > { %2516 = vmatpush2.bf16.msra.mxu1 %v3657_v17  ;;  %v3726_v17 = vld [vmem:[#allocation7 + $0x4d8] ss:$28 sps:$4 sm:$0xff]  }
 0x130   : > { %2517 = vmatprep.subr.bf16.mxu1 %v3665_v18  ;;  %v3731_v18 = vld [vmem:[#allocation7 + $0xc] ss:$28 sps:$4 sm:$0xff]  }
 0x131   : > { %2477 = vmatpush2.bf16.msra.mxu0 %v3648_v19  ;;  %v3734_v19 = vld [vmem:[#allocation7 + $0x4a4] ss:$28 sps:$4 sm:$0xff]  }
 0x132   : > { %2478 = vmatprep.subr.bf16.mxu0 %v3656_v20  ;;  %v3729_v20 = vld [vmem:[#allocation7 + $0x8] ss:$28 sps:$4 sm:$0xff]  }
 0x133   : > { %2518 = vmatpush2.bf16.msra.mxu1 %v3663_v22  ;;  %v3732_v22 = vld [vmem:[#allocation7 + $0x4a0] ss:$28 sps:$4 sm:$0xff]  }
 0x134   : > { %2519 = vmatprep.subr.bf16.mxu1 %v3671_v25  ;;  %v3735_v25 = vld [vmem:[#allocation7 + $0x350] ss:$28 sps:$4 sm:$0xff]  }
 0x135   : > { %2479 = vmatpush2.bf16.msra.mxu0 %v3654_v23  ;;  %v3737_v23 = vld [vmem:[#allocation7 + $0x354] ss:$28 sps:$4 sm:$0xff]  }
 0x136   : > { %2480 = vmatprep.subr.bf16.mxu0 %v3662_v24  ;;  %v3740_v24 = vld [vmem:[#allocation7 + $0x46c] ss:$28 sps:$4 sm:$0xff]  }
 0x137   : > { %2520 = vmatpush2.bf16.msra.mxu1 %v3669_v27  ;;  %v3743_v27 = vld [vmem:[#allocation7 + $0x31c] ss:$28 sps:$4 sm:$0xff]  }
 0x138   : > { %2521 = vmatprep.subr.bf16.mxu1 %v3677_v30  ;;  %v3744_v30 = vld [vmem:[#allocation7 + $0x430] ss:$28 sps:$4 sm:$0xff]  }
 0x139   : > { %2481 = vmatpush2.bf16.msra.mxu0 %v3660_v26  ;;  %v3738_v26 = vld [vmem:[#allocation7 + $0x468] ss:$28 sps:$4 sm:$0xff]  }
 0x13a   : > { %2482 = vmatprep.subr.bf16.mxu0 %v3668_v28  ;;  %v3746_v28 = vld [vmem:[#allocation7 + $0x434] ss:$28 sps:$4 sm:$0xff]  }
 0x13b   : > { %2522 = vmatpush2.bf16.msra.mxu1 %v3675_v29  ;;  %v3741_v29 = vld [vmem:[#allocation7 + $0x318] ss:$28 sps:$4 sm:$0xff]  }
 0x13c   : > { %2523 = vmatprep.subr.bf16.mxu1 %v3683_v34  ;;  %v3750_v34 = vld [vmem:[#allocation7 + $0x3f8] ss:$28 sps:$4 sm:$0xff]  }
 0x13d   : > { %2483 = vmatpush2.bf16.msra.mxu0 %v3666_v31  ;;  %v3749_v31 = vld [vmem:[#allocation7 + $0x2e4] ss:$28 sps:$4 sm:$0xff]  }
 0x13e   : > { %2534 = vmatprep.subr.bf16.mxu0 %v3674_v32  ;;  %v3752_v32 = vld [vmem:[#allocation7 + $0x3fc] ss:$28 sps:$4 sm:$0xff]  }
 0x13f   : > { %2524 = vmatpush2.bf16.msra.mxu1 %v3681_v33  ;;  %v3747_v33 = vld [vmem:[#allocation7 + $0x2e0] ss:$28 sps:$4 sm:$0xff]  }
 0x140   : > { %2575 = vmatprep.subr.bf16.mxu1 %v3689_v35  ;;  %v3755_v35 = vld [vmem:[#allocation7 + $0x2ac] ss:$28 sps:$4 sm:$0xff]  }
 0x1b3   : > { %v404_v37 = vpop.f32.mrf.mxu0  ;;  %v484_v47 = vpop.f32.mrf.mxu1 }
 0x1b4   : > { %v4404_v39 = vpack.c.bf16 %v404_v37, %v404_v37  ;;  %v4411_v48 = vpack.c.bf16 %v484_v47, %v484_v47  ;;  %v3753_v37 = vld [vmem:[#allocation7 + $0x2a8] ss:$28 sps:$4 sm:$0xff]   ;;  %v3770_v47 = vld [vmem:[#allocation7 + $0x6d4] ss:$28 sps:$4 sm:$0xff]  }
 0x1b5   : > { %v4409_v45 = vpop.f32.mrf.mxu0  ;;  %v4418_v3 = vpop.f32.mrf.mxu1 }
 0x1b6   : > { %2484 = vmatprep.mubr.bf16.mxu0 %v4404_v39 }
 0x1b7   : > { %2485 = vmatmul.mubr.bf16.vlgmr.msra.gmra.mxu0 %v4402_v38 }
 0x1b8   : > { %2535 = vmatpush1.bf16.msra.mxu0 %v3672_v40  ;;  %2566 = vmatprep.mubr.bf16.mxu0 %v4206_v5  ;;  %v3756_v40 = vld [vmem:[#allocation7 + $0x3c0] ss:$28 sps:$4 sm:$0xff]  }
 0x1b9   : > { %2536 = vmatprep.subr.bf16.mxu0 %v3680_v41  ;;  %v3761_v41 = vld [vmem:[#allocation7 + $0x274] ss:$28 sps:$4 sm:$0xff]  }
 0x1bc   : > { %2537 = vmatpush1.bf16.msra.mxu0 %v3678_v42  ;;  %v3764_v42 = vld [vmem:[#allocation7 + $0x38c] ss:$28 sps:$4 sm:$0xff]  }
 0x1bd   : > { %2538 = vmatprep.subr.bf16.mxu0 %v3686_v43  ;;  %v3759_v43 = vld [vmem:[#allocation7 + $0x270] ss:$28 sps:$4 sm:$0xff]  }
 0x1bf   : > { %v564_v49 = vpop.f32.mrf.mxu0 }
 0x1c0   : > { %v4413_v50 = vpack.c.bf16 %v564_v49, %v564_v49  ;;  %2539 = vmatpush1.bf16.msra.mxu0 %v3684_v44  ;;  %v3762_v44 = vld [vmem:[#allocation7 + $0x388] ss:$28 sps:$4 sm:$0xff]   ;;  %v3765_v49 = vld [vmem:[#allocation7 + $0x238] ss:$28 sps:$4 sm:$0xff]  }
 0x1c1   : > { %2540 = vmatprep.subr.bf16.mxu0 %v3692_v46  ;;  %v644_v7 = vpop.f32.mrf.mxu1  ;;  %v3767_v46 = vld [vmem:[#allocation7 + $0x23c] ss:$28 sps:$4 sm:$0xff]  }
 0x1c2   : > { %2525 = vmatprep.mubr.bf16.mxu1 %v4413_v50  ;;  %v4420_v10 = vpack.c.bf16 %v644_v7, %v644_v7  ;;  %v3800_v7 = vld [vmem:[#allocation7 + $0x5bc] ss:$28 sps:$4 sm:$0xff]  }
 0x1c3   : > { %2526 = vmatmul.mubr.bf16.vlgmr.msra.gmra.mxu1 %v4411_v48 }
 0x1c4   : > { %2576 = vmatpush1.bf16.msra.mxu1 %v3687_v51  ;;  %2541 = vmatpush1.bf16.msra.mxu0 %v3690_v52  ;;  %v3768_v51 = vld [vmem:[#allocation7 + $0x6d0] ss:$28 sps:$4 sm:$0xff]   ;;  %v3773_v52 = vld [vmem:[#allocation7 + $0x204] ss:$28 sps:$4 sm:$0xff]  }
 0x1c5   : > { %2607 = vmatprep.mubr.bf16.mxu1 %v4404_v39  ;;  %2577 = vmatprep.subr.bf16.mxu1 %v3695_v53  ;;  %v3776_v53 = vld [vmem:[#allocation7 + $0x69c] ss:$28 sps:$4 sm:$0xff]  }
 0x1c6   : > { %2542 = vmatprep.subr.bf16.mxu0 %v3698_v54  ;;  %v3771_v54 = vld [vmem:[#allocation7 + $0x200] ss:$28 sps:$4 sm:$0xff]  }
 0x1c8   : > { %2578 = vmatpush1.bf16.msra.mxu1 %v3693_v55  ;;  %2543 = vmatpush1.bf16.msra.mxu0 %v3696_v56  ;;  %v3774_v55 = vld [vmem:[#allocation7 + $0x698] ss:$28 sps:$4 sm:$0xff]   ;;  %v3779_v56 = vld [vmem:[#allocation7 + $0x1cc] ss:$28 sps:$4 sm:$0xff]  }
 0x1c9   : > { %2579 = vmatprep.subr.bf16.mxu1 %v3701_v57  ;;  %2544 = vmatprep.subr.bf16.mxu0 %v3704_v58  ;;  %v3782_v57 = vld [vmem:[#allocation7 + $0x664] ss:$28 sps:$4 sm:$0xff]  }
 0x1ca   : > { %v3777_v58 = vld [vmem:[#allocation7 + $0x1c8] ss:$28 sps:$4 sm:$0xff]  }
 0x1cc   : > { %2580 = vmatpush1.bf16.msra.mxu1 %v3699_v59  ;;  %2545 = vmatpush1.bf16.msra.mxu0 %v3702_v60  ;;  %v3780_v59 = vld [vmem:[#allocation7 + $0x660] ss:$28 sps:$4 sm:$0xff]   ;;  %v3785_v60 = vld [vmem:[#allocation7 + $0x894] ss:$28 sps:$4 sm:$0xff]  }
 0x1cd   : > { %2581 = vmatprep.subr.bf16.mxu1 %v3707_v61  ;;  %2546 = vmatprep.subr.bf16.mxu0 %v3710_v62  ;;  %v3788_v61 = vld [vmem:[#allocation7 + $0x62c] ss:$28 sps:$4 sm:$0xff]  }
 0x1ce   : > { %v3783_v62 = vld [vmem:[#allocation7 + $0x890] ss:$28 sps:$4 sm:$0xff]  }
 0x1d0   : > { %2582 = vmatpush1.bf16.msra.mxu1 %v3705_v63  ;;  %2547 = vmatpush1.bf16.msra.mxu0 %v3708_v0  ;;  %v3786_v63 = vld [vmem:[#allocation7 + $0x628] ss:$28 sps:$4 sm:$0xff]   ;;  %v3791_v0 = vld [vmem:[#allocation7 + $0x85c] ss:$28 sps:$4 sm:$0xff]  }
 0x1d1   : > { %2583 = vmatprep.subr.bf16.mxu1 %v3713_v1  ;;  %2548 = vmatprep.subr.bf16.mxu0 %v3716_v2  ;;  %v3794_v1 = vld [vmem:[#allocation7 + $0x5f4] ss:$28 sps:$4 sm:$0xff]  }
 0x1d2   : > { %v3789_v2 = vld [vmem:[#allocation7 + $0x858] ss:$28 sps:$4 sm:$0xff]  }
 0x1d4   : > { %2584 = vmatpush1.bf16.msra.mxu1 %v3711_v4  ;;  %2549 = vmatpush1.bf16.msra.mxu0 %v3714_v6  ;;  %v3792_v4 = vld [vmem:[#allocation7 + $0x5f0] ss:$28 sps:$4 sm:$0xff]   ;;  %v3797_v6 = vld [vmem:[#allocation7 + $0x824] ss:$28 sps:$4 sm:$0xff]  }
 0x1d5   : > { %2585 = vmatprep.subr.bf16.mxu1 %v3719_v8  ;;  %2616 = vmatprep.subr.bf16.mxu0 %v3722_v9  ;;  %v3795_v8 = vld [vmem:[#allocation7 + $0x820] ss:$28 sps:$4 sm:$0xff]   ;;  %v3798_v9 = vld [vmem:[#allocation7 + $0x5b8] ss:$28 sps:$4 sm:$0xff]  }
 0x1d7   : > { %2567 = vmatmul.mubr.bf16.vlgmr.msra.gmra.mxu0 %v4420_v10 }
 0x1d8   : > { %2586 = vmatpush1.bf16.msra.mxu1 %v3717_v12  ;;  %2617 = vmatpush1.bf16.msra.mxu0 %v3720_v13  ;;  %v3803_v12 = vld [vmem:[#allocation7 + $0x7ec] ss:$28 sps:$4 sm:$0xff]   ;;  %v3806_v13 = vld [vmem:[#allocation7 + $0x584] ss:$28 sps:$4 sm:$0xff]  }
 0x1d9   : > { %2648 = vmatprep.mubr.bf16.mxu0 %v4413_v50  ;;  %2587 = vmatprep.subr.bf16.mxu1 %v3725_v14  ;;  %v3801_v14 = vld [vmem:[#allocation7 + $0x7e8] ss:$28 sps:$4 sm:$0xff]  }
 0x1da   : > { %2618 = vmatprep.subr.bf16.mxu0 %v3728_v15  ;;  %v3804_v15 = vld [vmem:[#allocation7 + $0x580] ss:$28 sps:$4 sm:$0xff]  }
 0x1dc   : > { %2588 = vmatpush1.bf16.msra.mxu1 %v3723_v16  ;;  %2619 = vmatpush1.bf16.msra.mxu0 %v3726_v17  ;;  %v3809_v16 = vld [vmem:[#allocation7 + $0x7b4] ss:$28 sps:$4 sm:$0xff]   ;;  %v3812_v17 = vld [vmem:[#allocation7 + $0x54c] ss:$28 sps:$4 sm:$0xff]  }
 0x1dd   : > { %2589 = vmatprep.subr.bf16.mxu1 %v3731_v18  ;;  %2620 = vmatprep.subr.bf16.mxu0 %v3734_v19  ;;  %v3807_v18 = vld [vmem:[#allocation7 + $0x7b0] ss:$28 sps:$4 sm:$0xff]   ;;  %v3810_v19 = vld [vmem:[#allocation7 + $0x548] ss:$28 sps:$4 sm:$0xff]  }
 0x1e0   : > { %2590 = vmatpush1.bf16.msra.mxu1 %v3729_v20  ;;  %2621 = vmatpush1.bf16.msra.mxu0 %v3732_v22  ;;  %v3815_v20 = vld [vmem:[#allocation7 + $0x77c] ss:$28 sps:$4 sm:$0xff]  }
 0x1e1   : > { %2591 = vmatprep.subr.bf16.mxu1 %v3737_v23  ;;  %2622 = vmatprep.subr.bf16.mxu0 %v3740_v24  ;;  %v3818_v22 = vld [vmem:[#allocation7 + $0x19c] ss:$28 sps:$4 sm:$0xff]  }
 0x1e2   : > { %v3813_v23 = vld [vmem:[#allocation7 + $0x778] ss:$28 sps:$4 sm:$0xff]  }
 0x1e3   : > { %v3816_v24 = vld [vmem:[#allocation7 + $0x198] ss:$28 sps:$4 sm:$0xff]  }
 0x1e4   : > { %2592 = vmatpush2.bf16.msra.mxu1 %v3735_v25  ;;  %2623 = vmatpush1.bf16.msra.mxu0 %v3738_v26  ;;  %v3821_v25 = vld [vmem:[#allocation7 + $0x744] ss:$28 sps:$4 sm:$0xff]  }
 0x1e5   : > { %2593 = vmatprep.subr.bf16.mxu1 %v3743_v27  ;;  %2624 = vmatprep.subr.bf16.mxu0 %v3746_v28  ;;  %v3824_v26 = vld [vmem:[#allocation7 + $0x164] ss:$28 sps:$4 sm:$0xff]  }
 0x1e6   : > { %v3819_v27 = vld [vmem:[#allocation7 + $0x740] ss:$28 sps:$4 sm:$0xff]  }
 0x1e7   : > { %v3822_v28 = vld [vmem:[#allocation7 + $0x160] ss:$28 sps:$4 sm:$0xff]  }
 0x1e8   : > { %2594 = vmatpush2.bf16.msra.mxu1 %v3741_v29  ;;  %2625 = vmatpush1.bf16.msra.mxu0 %v3744_v30  ;;  %v3827_v29 = vld [vmem:[#allocation7 + $0x70c] ss:$28 sps:$4 sm:$0xff]  }
 0x1e9   : > { %2595 = vmatprep.subr.bf16.mxu1 %v3749_v31  ;;  %2626 = vmatprep.subr.bf16.mxu0 %v3752_v32  ;;  %v3830_v30 = vld [vmem:[#allocation7 + $0x12c] ss:$28 sps:$4 sm:$0xff]  }
 0x1ea   : > { %v3825_v31 = vld [vmem:[#allocation7 + $0x708] ss:$28 sps:$4 sm:$0xff]  }
 0x1eb   : > { %v3828_v32 = vld [vmem:[#allocation7 + $0x128] ss:$28 sps:$4 sm:$0xff]  }
 0x1ec   : > { %2596 = vmatpush2.bf16.msra.mxu1 %v3747_v33  ;;  %2627 = vmatpush1.bf16.msra.mxu0 %v3750_v34  ;;  %v3833_v33 = vld [vmem:[#allocation7 + $0x51c] ss:$28 sps:$4 sm:$0xff]   ;;  %v3836_v34 = vld [vmem:[#allocation7 + $0xf4] ss:$28 sps:$4 sm:$0xff]  }
 0x1ed   : > { %2597 = vmatprep.subr.bf16.mxu1 %v3755_v35  ;;  %2628 = vmatprep.subr.bf16.mxu0 %v3758_v36  ;;  %v3831_v35 = vld [vmem:[#allocation7 + $0x518] ss:$28 sps:$4 sm:$0xff]   ;;  %v3834_v36 = vld [vmem:[#allocation7 + $0xf0] ss:$28 sps:$4 sm:$0xff]  }
 0x1f0   : > { %2598 = vmatpush2.bf16.msra.mxu1 %v3753_v37  ;;  %2629 = vmatpush1.bf16.msra.mxu0 %v3756_v40  ;;  %v3839_v37 = vld [vmem:[#allocation7 + $0x4e4] ss:$28 sps:$4 sm:$0xff]   ;;  %v3842_v40 = vld [vmem:[#allocation7 + $0xbc] ss:$28 sps:$4 sm:$0xff]  }
 0x1f1   : > { %2599 = vmatprep.subr.bf16.mxu1 %v3761_v41  ;;  %2630 = vmatprep.subr.bf16.mxu0 %v3764_v42  ;;  %v3837_v41 = vld [vmem:[#allocation7 + $0x4e0] ss:$28 sps:$4 sm:$0xff]   ;;  %v3840_v42 = vld [vmem:[#allocation7 + $0xb8] ss:$28 sps:$4 sm:$0xff]  }
 0x1f4   : > { %2600 = vmatpush2.bf16.msra.mxu1 %v3759_v43  ;;  %2631 = vmatpush1.bf16.msra.mxu0 %v3762_v44  ;;  %v3845_v43 = vld [vmem:[#allocation7 + $0x4ac] ss:$28 sps:$4 sm:$0xff]   ;;  %v3848_v44 = vld [vmem:[#allocation7 + $0x84] ss:$28 sps:$4 sm:$0xff]  }
 0x1f5   : > { %2601 = vmatprep.subr.bf16.mxu1 %v3767_v46  ;;  %2632 = vmatprep.subr.bf16.mxu0 %v3770_v47  ;;  %v3843_v46 = vld [vmem:[#allocation7 + $0x4a8] ss:$28 sps:$4 sm:$0xff]   ;;  %v3846_v47 = vld [vmem:[#allocation7 + $0x80] ss:$28 sps:$4 sm:$0xff]  }
 0x1f8   : > { %2602 = vmatpush2.bf16.msra.mxu1 %v3765_v49  ;;  %2633 = vmatpush2.bf16.msra.mxu0 %v3768_v51  ;;  %v3851_v49 = vld [vmem:[#allocation7 + $0x474] ss:$28 sps:$4 sm:$0xff]   ;;  %v3854_v51 = vld [vmem:[#allocation7 + $0x4c] ss:$28 sps:$4 sm:$0xff]  }
 0x1f9   : > { %2603 = vmatprep.subr.bf16.mxu1 %v3773_v52  ;;  %2634 = vmatprep.subr.bf16.mxu0 %v3776_v53  ;;  %v3849_v52 = vld [vmem:[#allocation7 + $0x470] ss:$28 sps:$4 sm:$0xff]   ;;  %v3852_v53 = vld [vmem:[#allocation7 + $0x48] ss:$28 sps:$4 sm:$0xff]  }
 0x1fc   : > { %2604 = vmatpush2.bf16.msra.mxu1 %v3771_v54  ;;  %2635 = vmatpush2.bf16.msra.mxu0 %v3774_v55  ;;  %v3857_v54 = vld [vmem:[#allocation7 + $0x43c] ss:$28 sps:$4 sm:$0xff]   ;;  %v3860_v55 = vld [vmem:[#allocation7 + $0x14] ss:$28 sps:$4 sm:$0xff]  }
 0x1fd   : > { %2605 = vmatprep.subr.bf16.mxu1 %v3779_v56  ;;  %2636 = vmatprep.subr.bf16.mxu0 %v3782_v57  ;;  %v3855_v56 = vld [vmem:[#allocation7 + $0x438] ss:$28 sps:$4 sm:$0xff]   ;;  %v3858_v57 = vld [vmem:[#allocation7 + $0x10] ss:$28 sps:$4 sm:$0xff]  }
 0x200   : > { %2606 = vmatpush2.bf16.msra.mxu1 %v3777_v58  ;;  %2637 = vmatpush2.bf16.msra.mxu0 %v3780_v59  ;;  %v3863_v58 = vld [vmem:[#allocation7 + $0x404] ss:$28 sps:$4 sm:$0xff]   ;;  %v3866_v59 = vld [vmem:[#allocation7 + $0x35c] ss:$28 sps:$4 sm:$0xff]  }
 0x201   : > { %2657 = vmatprep.subr.bf16.mxu1 %v3785_v60  ;;  %2638 = vmatprep.subr.bf16.mxu0 %v3788_v61  ;;  %v3861_v60 = vld [vmem:[#allocation7 + $0x400] ss:$28 sps:$4 sm:$0xff]   ;;  %v3864_v61 = vld [vmem:[#allocation7 + $0x358] ss:$28 sps:$4 sm:$0xff]  }
 0x203   : > { %2608 = vmatmul.mubr.bf16.vlgmr.msra.gmra.mxu1 %v4402_v38 }
 0x204   : > { %2658 = vmatpush1.bf16.msra.mxu1 %v3783_v62  ;;  %2639 = vmatpush2.bf16.msra.mxu0 %v3786_v63  ;;  %v3869_v62 = vld [vmem:[#allocation7 + $0x3cc] ss:$28 sps:$4 sm:$0xff]   ;;  %v3872_v63 = vld [vmem:[#allocation7 + $0x324] ss:$28 sps:$4 sm:$0xff]  }
 0x205   : > { %2659 = vmatprep.subr.bf16.mxu1 %v3791_v0  ;;  %2640 = vmatprep.subr.bf16.mxu0 %v3794_v1  ;;  %v3867_v0 = vld [vmem:[#allocation7 + $0x3c8] ss:$28 sps:$4 sm:$0xff]   ;;  %v3870_v1 = vld [vmem:[#allocation7 + $0x320] ss:$28 sps:$4 sm:$0xff]  }
 0x206   : > { %2689 = vmatprep.mubr.bf16.mxu1 %v4206_v5 }
 0x208   : > { %2660 = vmatpush1.bf16.msra.mxu1 %v3789_v2  ;;  %2641 = vmatpush2.bf16.msra.mxu0 %v3792_v4  ;;  %v3875_v2 = vld [vmem:[#allocation7 + $0x394] ss:$28 sps:$4 sm:$0xff]   ;;  %v3878_v4 = vld [vmem:[#allocation7 + $0x2ec] ss:$28 sps:$4 sm:$0xff]  }
 0x209   : > { %2661 = vmatprep.subr.bf16.mxu1 %v3797_v6  ;;  %2642 = vmatprep.subr.bf16.mxu0 %v3800_v7  ;;  %v3873_v6 = vld [vmem:[#allocation7 + $0x390] ss:$28 sps:$4 sm:$0xff]   ;;  %v3876_v7 = vld [vmem:[#allocation7 + $0x2e8] ss:$28 sps:$4 sm:$0xff]  }
 0x20c   : > { %2662 = vmatpush1.bf16.msra.mxu1 %v3795_v8  ;;  %2643 = vmatpush2.bf16.msra.mxu0 %v3798_v9  ;;  %v3881_v8 = vld [vmem:[#allocation7 + $0x6dc] ss:$28 sps:$4 sm:$0xff]   ;;  %v3884_v9 = vld [vmem:[#allocation7 + $0x2b4] ss:$28 sps:$4 sm:$0xff]  }
 0x20d   : > { %2663 = vmatprep.subr.bf16.mxu1 %v3803_v12  ;;  %2644 = vmatprep.subr.bf16.mxu0 %v3806_v13  ;;  %v3879_v12 = vld [vmem:[#allocation7 + $0x6d8] ss:$28 sps:$4 sm:$0xff]   ;;  %v3882_v13 = vld [vmem:[#allocation7 + $0x2b0] ss:$28 sps:$4 sm:$0xff]  }
 0x210   : > { %2664 = vmatpush1.bf16.msra.mxu1 %v3801_v14  ;;  %2645 = vmatpush2.bf16.msra.mxu0 %v3804_v15  ;;  %v3887_v14 = vld [vmem:[#allocation7 + $0x6a4] ss:$28 sps:$4 sm:$0xff]   ;;  %v3890_v15 = vld [vmem:[#allocation7 + $0x27c] ss:$28 sps:$4 sm:$0xff]  }
 0x211   : > { %2665 = vmatprep.subr.bf16.mxu1 %v3809_v16  ;;  %2646 = vmatprep.subr.bf16.mxu0 %v3812_v17  ;;  %v3885_v16 = vld [vmem:[#allocation7 + $0x6a0] ss:$28 sps:$4 sm:$0xff]   ;;  %v3888_v17 = vld [vmem:[#allocation7 + $0x278] ss:$28 sps:$4 sm:$0xff]  }
 0x214   : > { %2666 = vmatpush1.bf16.msra.mxu1 %v3807_v18  ;;  %2647 = vmatpush2.bf16.msra.mxu0 %v3810_v19  ;;  %v3893_v18 = vld [vmem:[#allocation7 + $0x66c] ss:$28 sps:$4 sm:$0xff]   ;;  %v3896_v19 = vld [vmem:[#allocation7 + $0x244] ss:$28 sps:$4 sm:$0xff]  }
 0x215   : > { %2667 = vmatprep.subr.bf16.mxu1 %v3815_v20  ;;  %2698 = vmatprep.subr.bf16.mxu0 %v3818_v22  ;;  %v3891_v20 = vld [vmem:[#allocation7 + $0x668] ss:$28 sps:$4 sm:$0xff]   ;;  %v3894_v22 = vld [vmem:[#allocation7 + $0x240] ss:$28 sps:$4 sm:$0xff]  }
 0x217   : > { %2649 = vmatmul.mubr.bf16.vlgmr.msra.gmra.mxu0 %v4411_v48 }
 0x218   : > { %2668 = vmatpush1.bf16.msra.mxu1 %v3813_v23  ;;  %2699 = vmatpush1.bf16.msra.mxu0 %v3816_v24  ;;  %v3899_v23 = vld [vmem:[#allocation7 + $0x634] ss:$28 sps:$4 sm:$0xff]   ;;  %v3902_v24 = vld [vmem:[#allocation7 + $0x20c] ss:$28 sps:$4 sm:$0xff]  }
 0x219   : > { %2730 = vmatprep.mubr.bf16.mxu0 %v4404_v39  ;;  %2669 = vmatprep.subr.bf16.mxu1 %v3821_v25  ;;  %v3897_v25 = vld [vmem:[#allocation7 + $0x630] ss:$28 sps:$4 sm:$0xff]  }
 0x21a   : > { %2700 = vmatprep.subr.bf16.mxu0 %v3824_v26  ;;  %v3900_v26 = vld [vmem:[#allocation7 + $0x208] ss:$28 sps:$4 sm:$0xff]  }
 0x21c   : > { %2670 = vmatpush1.bf16.msra.mxu1 %v3819_v27  ;;  %2701 = vmatpush1.bf16.msra.mxu0 %v3822_v28  ;;  %v3905_v27 = vld [vmem:[#allocation7 + $0x5fc] ss:$28 sps:$4 sm:$0xff]   ;;  %v3908_v28 = vld [vmem:[#allocation7 + $0x1d4] ss:$28 sps:$4 sm:$0xff]  }
 0x21d   : > { %2671 = vmatprep.subr.bf16.mxu1 %v3827_v29  ;;  %2702 = vmatprep.subr.bf16.mxu0 %v3830_v30  ;;  %v3903_v29 = vld [vmem:[#allocation7 + $0x5f8] ss:$28 sps:$4 sm:$0xff]   ;;  %v3906_v30 = vld [vmem:[#allocation7 + $0x1d0] ss:$28 sps:$4 sm:$0xff]  }
 0x220   : > { %2672 = vmatpush1.bf16.msra.mxu1 %v3825_v31  ;;  %2703 = vmatpush1.bf16.msra.mxu0 %v3828_v32  ;;  %v3911_v31 = vld [vmem:[#allocation7 + $0x5c4] ss:$28 sps:$4 sm:$0xff]   ;;  %v3914_v32 = vld [vmem:[#allocation7 + $0x89c] ss:$28 sps:$4 sm:$0xff]  }
 0x221   : > { %2739 = vmatprep.subr.bf16.mxu1 %v3833_v33  ;;  %2704 = vmatprep.subr.bf16.mxu0 %v3836_v34  ;;  %v3909_v33 = vld [vmem:[#allocation7 + $0x5c0] ss:$28 sps:$4 sm:$0xff]   ;;  %v3912_v34 = vld [vmem:[#allocation7 + $0x898] ss:$28 sps:$4 sm:$0xff]  }
 0x223   : > { %2690 = vmatmul.mubr.bf16.vlgmr.msra.gmra.mxu1 %v4420_v10 }
 0x224   : > { %2740 = vmatpush1.bf16.msra.mxu1 %v3831_v35  ;;  %2771 = vmatprep.mubr.bf16.mxu1 %v4413_v50  ;;  %v3917_v35 = vld [vmem:[#allocation7 + $0x58c] ss:$28 sps:$4 sm:$0xff]  }
 0x225   : > { %2705 = vmatpush1.bf16.msra.mxu0 %v3834_v36  ;;  %2741 = vmatprep.subr.bf16.mxu1 %v3839_v37  ;;  %v3920_v36 = vld [vmem:[#allocation7 + $0x864] ss:$28 sps:$4 sm:$0xff]  }
 0x226   : > { %2706 = vmatprep.subr.bf16.mxu0 %v3842_v40  ;;  %v3915_v37 = vld [vmem:[#allocation7 + $0x588] ss:$28 sps:$4 sm:$0xff]   ;;  %v3918_v40 = vld [vmem:[#allocation7 + $0x860] ss:$28 sps:$4 sm:$0xff]  }
 0x228   : > { %2742 = vmatpush1.bf16.msra.mxu1 %v3837_v41  ;;  %v3923_v41 = vld [vmem:[#allocation7 + $0x554] ss:$28 sps:$4 sm:$0xff]  }
 0x229   : > { %2707 = vmatpush1.bf16.msra.mxu0 %v3840_v42  ;;  %2743 = vmatprep.subr.bf16.mxu1 %v3845_v43  ;;  %v3926_v42 = vld [vmem:[#allocation7 + $0x82c] ss:$28 sps:$4 sm:$0xff]  }
 0x22a   : > { %2708 = vmatprep.subr.bf16.mxu0 %v3848_v44  ;;  %v3921_v43 = vld [vmem:[#allocation7 + $0x550] ss:$28 sps:$4 sm:$0xff]   ;;  %v3924_v44 = vld [vmem:[#allocation7 + $0x828] ss:$28 sps:$4 sm:$0xff]  }
 0x22c   : > { %2744 = vmatpush1.bf16.msra.mxu1 %v3843_v46  ;;  %v3927_v46 = vld [vmem:[#allocation7 + $0x360] ss:$28 sps:$4 sm:$0xff]  }
 0x22d   : > { %2709 = vmatpush1.bf16.msra.mxu0 %v3846_v47  ;;  %2745 = vmatprep.subr.bf16.mxu1 %v3851_v49  ;;  %v3930_v47 = vld [vmem:[#allocation7 + $0x7f4] ss:$28 sps:$4 sm:$0xff]   ;;  %v3931_v49 = vld [vmem:[#allocation7 + $0x1a0] ss:$28 sps:$4 sm:$0xff]  }
 0x22e   : > { %2710 = vmatprep.subr.bf16.mxu0 %v3854_v51  ;;  %v3928_v51 = vld [vmem:[#allocation7 + $0x7f0] ss:$28 sps:$4 sm:$0xff]  }
 0x230   : > { %2746 = vmatpush1.bf16.msra.mxu1 %v3849_v52  ;;  %v3932_v52 = vld [vmem:[#allocation7 + $0x328] ss:$28 sps:$4 sm:$0xff]  }
 0x231   : > { %2711 = vmatpush1.bf16.msra.mxu0 %v3852_v53  ;;  %2747 = vmatprep.subr.bf16.mxu1 %v3857_v54  ;;  %v3935_v53 = vld [vmem:[#allocation7 + $0x7bc] ss:$28 sps:$4 sm:$0xff]  }
 0x232   : > { %2712 = vmatprep.subr.bf16.mxu0 %v3860_v55  ;;  %v3933_v54 = vld [vmem:[#allocation7 + $0x7b8] ss:$28 sps:$4 sm:$0xff]   ;;  %v3937_v55 = vld [vmem:[#allocation7 + $0x2f0] ss:$28 sps:$4 sm:$0xff]  }
 0x234   : > { %2748 = vmatpush1.bf16.msra.mxu1 %v3855_v56  ;;  %v3940_v56 = vld [vmem:[#allocation7 + $0x784] ss:$28 sps:$4 sm:$0xff]  }
 0x235   : > { %2713 = vmatpush1.bf16.msra.mxu0 %v3858_v57  ;;  %2749 = vmatprep.subr.bf16.mxu1 %v3863_v58  ;;  %v3941_v57 = vld [vmem:[#allocation7 + $0x130] ss:$28 sps:$4 sm:$0xff]   ;;  %v3938_v58 = vld [vmem:[#allocation7 + $0x780] ss:$28 sps:$4 sm:$0xff]  }
 0x236   : > { %2714 = vmatprep.subr.bf16.mxu0 %v3866_v59  ;;  %v3942_v59 = vld [vmem:[#allocation7 + $0x2b8] ss:$28 sps:$4 sm:$0xff]  }
 0x238   : > { %2750 = vmatpush1.bf16.msra.mxu1 %v3861_v60  ;;  %v3945_v60 = vld [vmem:[#allocation7 + $0x74c] ss:$28 sps:$4 sm:$0xff]  }
 0x239   : > { %2715 = vmatpush2.bf16.msra.mxu0 %v3864_v61  ;;  %2751 = vmatprep.subr.bf16.mxu1 %v3869_v62  ;;  %v4435_v61 = vshrl.u32 %v314_v21, 7  ;;  %v3943_v62 = vld [vmem:[#allocation7 + $0x748] ss:$28 sps:$4 sm:$0xff]   ;;  %v3954_v21 = vld [vmem:[#allocation7 + $0x6e0] ss:$28 sps:$4 sm:$0xff]  }
 0x23a   : > { %2716 = vmatprep.subr.bf16.mxu0 %v3872_v63  ;;  %v3947_v63 = vld [vmem:[#allocation7 + $0x280] ss:$28 sps:$4 sm:$0xff]  }
 0x23c   : > { %2752 = vmatpush1.bf16.msra.mxu1 %v3867_v0  ;;  %v3950_v0 = vld [vmem:[#allocation7 + $0x714] ss:$28 sps:$4 sm:$0xff]  }
 0x23d   : > { %2717 = vmatpush2.bf16.msra.mxu0 %v3870_v1  ;;  %2753 = vmatprep.subr.bf16.mxu1 %v3875_v2  ;;  %v3951_v1 = vld [vmem:[#allocation7 + $0xc0] ss:$28 sps:$4 sm:$0xff]   ;;  %v979_v2 = vsub.s32 0, %v4435_v61 }
 0x23e   : > { %2718 = vmatprep.subr.bf16.mxu0 %v3878_v4  ;;  %v3948_v4 = vld [vmem:[#allocation7 + $0x710] ss:$28 sps:$4 sm:$0xff]  }
 0x240   : > { %2754 = vmatpush1.bf16.msra.mxu1 %v3873_v6  ;;  %v3952_v6 = vld [vmem:[#allocation7 + $0x248] ss:$28 sps:$4 sm:$0xff]  }
 0x241   : > { %2719 = vmatpush2.bf16.msra.mxu0 %v3876_v7  ;;  %2755 = vmatprep.subr.bf16.mxu1 %v3881_v8  ;;  %v4438_v7 = vld [vmem:[#allocation9] sm:$0xff]  ;;  %v983_v8 = vsub.s32 1, %v4435_v61 }
 0x242   : > { %2720 = vmatprep.subr.bf16.mxu0 %v3884_v9  ;;  %v3953_v9 = vld [vmem:[#allocation7 + $0x88] ss:$28 sps:$4 sm:$0xff]  }
 0x244   : > { %2756 = vmatpush2.bf16.msra.mxu1 %v3879_v12  ;;  %v980_v12 = vrot.slane %v4438_v7, %v979_v2 }
 0x245   : > { %2721 = vmatpush2.bf16.msra.mxu0 %v3882_v13  ;;  %2757 = vmatprep.subr.bf16.mxu1 %v3887_v14  ;;  %v4442_v13 = vpop.f32.mrf.mxu0  ;;  %v3955_v14 = vld [vmem:[#allocation7 + $0x520] ss:$28 sps:$4 sm:$0xff]  }
 0x246   : > { %2722 = vmatprep.subr.bf16.mxu0 %v3890_v15  ;;  %v984_v15 = vrot.slane %v4438_v7, %v983_v8 }
 0x248   : > { %2758 = vmatpush2.bf16.msra.mxu1 %v3885_v16  ;;  %v3956_v16 = vld [vmem:[#allocation7 + $0x210] ss:$28 sps:$4 sm:$0xff]  }
 0x249   : > { %2723 = vmatpush2.bf16.msra.mxu0 %v3888_v17  ;;  %2759 = vmatprep.subr.bf16.mxu1 %v3893_v18  ;;  %v3958_v17 = vld [vmem:[#allocation7 + $0x6a8] ss:$28 sps:$4 sm:$0xff]  }
 0x24a   : > { %2724 = vmatprep.subr.bf16.mxu0 %v3896_v19 }
 0x24c   : > { %2760 = vmatpush2.bf16.msra.mxu1 %v3891_v20  ;;  %v3957_v20 = vld [vmem:[#allocation7 + $0x50] ss:$28 sps:$4 sm:$0xff]  }
 0x24d   : > { %2725 = vmatpush2.bf16.msra.mxu0 %v3894_v22  ;;  %2761 = vmatprep.subr.bf16.mxu1 %v3899_v23  ;;  %v3959_v23 = vld [vmem:[#allocation7 + $0x4e8] ss:$28 sps:$4 sm:$0xff]  }
 0x24e   : > { %2726 = vmatprep.subr.bf16.mxu0 %v3902_v24  ;;  %v3960_v24 = vld [vmem:[#allocation7 + $0x1d8] ss:$28 sps:$4 sm:$0xff]  }
 0x250   : > { %2762 = vmatpush2.bf16.msra.mxu1 %v3897_v25 }
 0x251   : > { %2727 = vmatpush2.bf16.msra.mxu0 %v3900_v26  ;;  %2763 = vmatprep.subr.bf16.mxu1 %v3905_v27  ;;  %v3962_v26 = vld [vmem:[#allocation7 + $0x670] ss:$28 sps:$4 sm:$0xff]  }
 0x252   : > { %2728 = vmatprep.subr.bf16.mxu0 %v3908_v28  ;;  %v3961_v28 = vld [vmem:[#allocation7 + $0x18] ss:$28 sps:$4 sm:$0xff]  }
 0x254   : > { %2764 = vmatpush2.bf16.msra.mxu1 %v3903_v29 }
 0x255   : > { %2729 = vmatpush2.bf16.msra.mxu0 %v3906_v30  ;;  %2765 = vmatprep.subr.bf16.mxu1 %v3911_v31  ;;  %v3963_v30 = vld [vmem:[#allocation7 + $0x4b0] ss:$28 sps:$4 sm:$0xff]   ;;  %v3964_v31 = vld [vmem:[#allocation7 + $0x638] ss:$28 sps:$4 sm:$0xff]  }
 0x256   : > { %2780 = vmatprep.subr.bf16.mxu0 %v3914_v32  ;;  %v3965_v32 = vld [vmem:[#allocation7 + $0x8a0] ss:$28 sps:$4 sm:$0xff]  }
 0x258   : > { %2731 = vmatmul.mubr.bf16.vlgmr.msra.gmra.mxu0 %v4402_v38  ;;  %2766 = vmatpush2.bf16.msra.mxu1 %v3909_v33  ;;  %v4447_v33 = vpop.f32.mrf.mxu1 }
 0x259   : > { %2781 = vmatpush1.bf16.msra.mxu0 %v3912_v34  ;;  %2767 = vmatprep.subr.bf16.mxu1 %v3917_v35  ;;  %v3967_v34 = vld [vmem:[#allocation7 + $0x600] ss:$28 sps:$4 sm:$0xff]  }
 0x25a   : > { %2782 = vmatprep.subr.bf16.mxu0 %v3920_v36  ;;  %2812 = vmatprep.mubr.bf16.mxu0 %v4206_v5  ;;  %v3936_v5 = vld [vmem:[#allocation7 + $0x168] ss:$28 sps:$4 sm:$0xff]  }
 0x25c   : > { %2768 = vmatpush2.bf16.msra.mxu1 %v3915_v37  ;;  %v3968_v37 = vld [vmem:[#allocation7 + $0x868] ss:$28 sps:$4 sm:$0xff]  }
 0x25d   : > { %2783 = vmatpush1.bf16.msra.mxu0 %v3918_v40  ;;  %2769 = vmatprep.subr.bf16.mxu1 %v3923_v41  ;;  %v3969_v41 = vld [vmem:[#allocation7 + $0x440] ss:$28 sps:$4 sm:$0xff]  }
 0x25e   : > { %2784 = vmatprep.subr.bf16.mxu0 %v3926_v42 }
 0x260   : > { %2770 = vmatpush2.bf16.msra.mxu1 %v3921_v43  ;;  %v3970_v43 = vld [vmem:[#allocation7 + $0x5c8] ss:$28 sps:$4 sm:$0xff]  }
 0x261   : > { %2785 = vmatpush1.bf16.msra.mxu0 %v3924_v44  ;;  %3414 = vmatprep.subr.bf16.mxu1 %v3927_v46  ;;  %v3971_v46 = vld [vmem:[#allocation7 + $0x830] ss:$28 sps:$4 sm:$0xff]  }
 0x262   : > { %2786 = vmatprep.subr.bf16.mxu0 %v3930_v47  ;;  %v3972_v47 = vld [vmem:[#allocation7 + $0x408] ss:$28 sps:$4 sm:$0xff]  }
 0x263   : > { %2772 = vmatmul.mubr.bf16.vlgmr.msra.gmra.mxu1 %v4411_v48 }
 0x264   : > { %3415 = vmatpush3.bf16.msra.mxu1 %v3931_v49  ;;  %2853 = vmatprep.mubr.bf16.mxu1 %v4404_v39  ;;  %v3946_v39 = vld [vmem:[#allocation7 + $0xf8] ss:$28 sps:$4 sm:$0xff]   ;;  %v3973_v49 = vld [vmem:[#allocation7 + $0x590] ss:$28 sps:$4 sm:$0xff]  }
 0x265   : > { %2787 = vmatpush1.bf16.msra.mxu0 %v3928_v51  ;;  %3416 = vmatprep.subr.bf16.mxu1 %v3932_v52  ;;  %v3974_v51 = vld [vmem:[#allocation7 + $0x7f8] ss:$28 sps:$4 sm:$0xff]   ;;  %v3975_v52 = vld [vmem:[#allocation7 + $0x3d0] ss:$28 sps:$4 sm:$0xff]  }
 0x266   : > { %2788 = vmatprep.subr.bf16.mxu0 %v3935_v53  ;;  %v3976_v53 = vld [vmem:[#allocation7 + $0x558] ss:$28 sps:$4 sm:$0xff]  }
 0x268   : > { %3417 = vmatpush3.bf16.msra.mxu1 %v3936_v5  ;;  %v3977_v5 = vld [vmem:[#allocation7 + $0x7c0] ss:$28 sps:$4 sm:$0xff]  }
 0x269   : > { %2789 = vmatpush1.bf16.msra.mxu0 %v3933_v54  ;;  %3418 = vmatprep.subr.bf16.mxu1 %v3937_v55  ;;  %v3978_v54 = vld [vmem:[#allocation7 + $0x398] ss:$28 sps:$4 sm:$0xff]   ;;  %v3979_v55 = vld [vmem:[#allocation7 + $0x788] ss:$28 sps:$4 sm:$0xff]  }
 0x26a   : > { %2790 = vmatprep.subr.bf16.mxu0 %v3940_v56 }
 0x26c   : > { %3419 = vmatpush3.bf16.msra.mxu1 %v3941_v57 }
 0x26d   : > { %2791 = vmatpush1.bf16.msra.mxu0 %v3938_v58  ;;  %3420 = vmatprep.subr.bf16.mxu1 %v3942_v59  ;;  %v3980_v58 = vld [vmem:[#allocation7 + $0x750] ss:$28 sps:$4 sm:$0xff]  }
 0x26e   : > { %2792 = vmatprep.subr.bf16.mxu0 %v3945_v60 }
 0x270   : > { %3421 = vmatpush3.bf16.msra.mxu1 %v3946_v39 }
 0x271   : > { %2793 = vmatpush1.bf16.msra.mxu0 %v3943_v62  ;;  %3422 = vmatprep.subr.bf16.mxu1 %v3947_v63  ;;  %v3981_v62 = vld [vmem:[#allocation7 + $0x718] ss:$28 sps:$4 sm:$0xff]  }
 0x272   : > { %2794 = vmatprep.subr.bf16.mxu0 %v3950_v0  ;;  %v987_v0 = vsub.s32 2, %v4435_v61 }
 0x274   : > { %3423 = vmatpush3.bf16.msra.mxu1 %v3951_v1  ;;  %v988_v1 = vrot.slane %v4438_v7, %v987_v0 }
 0x275   : > { %2795 = vmatpush1.bf16.msra.mxu0 %v3948_v4  ;;  %3424 = vmatprep.subr.bf16.mxu1 %v3952_v6 }
 0x276   : > { %3436 = vmatprep.subr.bf16.mxu0 %v3954_v21 }
 0x277   : > { %v2486_v18 = vpop.f32.mrf.mxu0 }
 0x278   : > { %2813 = vmatmul.mubr.bf16.vlgmr.msra.gmra.mxu0 %v4420_v10  ;;  %3425 = vmatpush3.bf16.msra.mxu1 %v3953_v9  ;;  %v2487_v19 = vadd.f32 %v2486_v18, %v980_v12 }
 0x279   : > { %3437 = vmatpush3.bf16.msra.mxu0 %v3955_v14  ;;  %2893 = vmatprep.mubr.bf16.mxu0 %v4413_v50  ;;  %v2488_v22 = vpop.f32.mrf.mxu0  ;;  %v3966_v50 = vld [vmem:[#allocation7 + $0x478] ss:$28 sps:$4 sm:$0xff]  }
 0x27a   : > { %v2489_v25 = vadd.f32 %v2488_v22, %v984_v15  ;;  %3426 = vmatprep.subr.bf16.mxu1 %v3956_v16  ;;  %3438 = vmatprep.subr.bf16.mxu0 %v3958_v17 }
 0x27b   : > { %v2490_v27 = vpop.f32.mrf.mxu0 }
 0x27c   : > { %3427 = vmatpush3.bf16.msra.mxu1 %v3957_v20 }
 0x27d   : > { %3439 = vmatpush3.bf16.msra.mxu0 %v3959_v23  ;;  %v2491_v29 = vpop.f32.mrf.mxu0  ;;  %3428 = vmatprep.subr.bf16.mxu1 %v3960_v24 }
 0x27e   : > { %3440 = vmatprep.subr.bf16.mxu0 %v3962_v26 }
 0x280   : > { %3429 = vmatpush3.bf16.msra.mxu1 %v3961_v28 }
 0x281   : > { %3441 = vmatpush3.bf16.msra.mxu0 %v3963_v30  ;;  %3467 = vmatprep.subr.bf16.mxu1 %v4208_v11 }
 0x282   : > { %3442 = vmatprep.subr.bf16.mxu0 %v3964_v31 }
 0x283   : > { %2854 = vmatmul.mubr.bf16.vlgmr.msra.gmra.mxu1 %v4402_v38  ;;  %v2527_v35 = vpop.f32.mrf.mxu1 }
 0x284   : > { %v2528_v36 = vadd.f32 %v2527_v35, %v2487_v19  ;;  %3468 = vmatpush3.bf16.msra.mxu1 %v3965_v32  ;;  %3483 = vmatprep.mubr.msk.bf16.mxu1 %vm4211_vm5, %v4208_v11 }
 0x285   : > { %3443 = vmatpush3.bf16.msra.mxu0 %v3966_v50  ;;  %v2529_v40 = vpop.f32.mrf.mxu1  ;;  %3469 = vmatprep.subr.bf16.mxu1 %v4208_v11  ;;  %v995_v50 = vsub.s32 4, %v4435_v61 }
 0x286   : > { %v2530_v42 = vadd.f32 %v2529_v40, %v2489_v25  ;;  %3444 = vmatprep.subr.bf16.mxu0 %v3967_v34  ;;  %v999_v34 = vsub.s32 5, %v4435_v61 }
 0x287   : > { %v2531_v44 = vpop.f32.mrf.mxu1  ;;  %v996_v35 = vrot.slane %v4438_v7, %v995_v50 }
 0x288   : > { %3470 = vmatpush3.bf16.msra.mxu1 %v3968_v37 }
 0x289   : > { %3445 = vmatpush3.bf16.msra.mxu0 %v3969_v41  ;;  %v2532_v38 = vpop.f32.mrf.mxu1  ;;  %3471 = vmatprep.subr.bf16.mxu1 %v4208_v11 }
 0x28a   : > { %3446 = vmatprep.subr.bf16.mxu0 %v3970_v43 }
 0x28c   : > { %3472 = vmatpush3.bf16.msra.mxu1 %v3971_v46 }
 0x28d   : > { %3447 = vmatpush3.bf16.msra.mxu0 %v3972_v47  ;;  %3473 = vmatprep.subr.bf16.mxu1 %v4208_v11 }
 0x28e   : > { %3448 = vmatprep.subr.bf16.mxu0 %v3973_v49 }
 0x290   : > { %3474 = vmatpush3.bf16.msra.mxu1 %v3974_v51 }
 0x291   : > { %3449 = vmatpush3.bf16.msra.mxu0 %v3975_v52  ;;  %3475 = vmatprep.subr.bf16.mxu1 %v4208_v11 }
 0x292   : > { %3450 = vmatprep.subr.bf16.mxu0 %v3976_v53 }
 0x294   : > { %3476 = vmatpush3.bf16.msra.mxu1 %v3977_v5 }
 0x295   : > { %3451 = vmatpush3.bf16.msra.mxu0 %v3978_v54  ;;  %3477 = vmatprep.subr.bf16.mxu1 %v4208_v11 }
 0x297   : > { %v2568_v56 = vpop.f32.mrf.mxu0 }
 0x298   : > { %v2569_v57 = vadd.f32 %v2568_v56, %v2528_v36  ;;  %2894 = vmatmul.mubr.bf16.vlgmr.msra.gmra.mxu0 %v4411_v48  ;;  %3478 = vmatpush3.bf16.msra.mxu1 %v3979_v55  ;;  %v991_v48 = vsub.s32 3, %v4435_v61  ;;  %v1000_v36 = vrot.slane %v4438_v7, %v999_v34 }
 0x299   : > { %v2570_v59 = vpop.f32.mrf.mxu0  ;;  %3479 = vmatprep.subr.bf16.mxu1 %v4208_v11 }
 0x29a   : > { %v4459_v60 = vadd.f32 %v2570_v59, %v2530_v42  ;;  %v992_v2 = vrot.slane %v4438_v7, %v991_v48  ;;  %v2941_v12 = vsub.f32 0.0, %v2569_v57 }
 0x29b   : > { %v2572_v39 = vpop.f32.mrf.mxu0 }
 0x29c   : > { %3480 = vmatpush3.bf16.msra.mxu1 %v3980_v58  ;;  %v2942_v15 = vmul.f32 1.442695, %v2941_v12 }
 0x29d   : > { %v2573_v63 = vpop.f32.mrf.mxu0  ;;  %3481 = vmatprep.subr.bf16.mxu1 %v4208_v11 }
 0x29e   : > { %3982 = vpow2.f32 %v2942_v15  ;;  %v1003_v15 = vsub.s32 6, %v4435_v61 }
 0x2a0   : > { %3482 = vmatpush3.bf16.msra.mxu1 %v3981_v62 }
 0x2a3   : > { %3484 = vmatmul.mubr.bf16.vlgmr.msra.gmra.mxu1 %v4420_v10 }
 0x2ab   : > { %v3983_v22 = vpop.eup %3982 }
 0x2ac   : > { %v2944_v23 = vadd.f32 1.0, %v3983_v22 }
 0x2ae   : > { %3984 = vrcp.f32 %v2944_v23 }
 0x2bb   : > { %v3985_v30 = vpop.eup %3984 }
 0x2c3   : > { %v2609_v4 = vpop.f32.mrf.mxu1 }
 0x2c4   : > { %v2610_v6 = vadd.f32 %v2609_v4, %v988_v1 }
 0x2c5   : > { %v2611_v21 = vpop.f32.mrf.mxu1 }
 0x2c6   : > { %v2612_v8 = vadd.f32 %v2611_v21, %v992_v2 }
 0x2c7   : > { %v2613_v9 = vpop.f32.mrf.mxu1 }
 0x2c9   : > { %v2614_v14 = vpop.f32.mrf.mxu1 }
 0x2d7   : > { %v2650_v16 = vpop.f32.mrf.mxu0 }
 0x2d8   : > { %v2651_v17 = vadd.f32 %v2650_v16, %v2610_v6 }
 0x2d9   : > { %v2652_v10 = vpop.f32.mrf.mxu0 }
 0x2da   : > { %v2653_v18 = vadd.f32 %v2652_v10, %v2612_v8 }
 0x2db   : > { %v2654_v19 = vpop.f32.mrf.mxu0 }
 0x2dc   : > { %v1004_v19 = vrot.slane %v4438_v7, %v1003_v15 }
 0x2dd   : > { %v2655_v20 = vpop.f32.mrf.mxu0 }
 0x2e3   : > { %v2691_v24 = vpop.f32.mrf.mxu1 }
 0x2e4   : > { %v2692_v25 = vadd.f32 %v2691_v24, %v2651_v17 }
 0x2e5   : > { %v2693_v26 = vpop.f32.mrf.mxu1 }
 0x2e6   : > { %3986 = vtanh.f32 %v2692_v25  ;;  %v2694_v27 = vadd.f32 %v2693_v26, %v2653_v18 }
 0x2e7   : > { %v2695_v28 = vpop.f32.mrf.mxu1 }
 0x2e8   : > { %v2952_v51 = vsub.f32 0.0, %v2694_v27 }
 0x2e9   : > { %v2696_v29 = vpop.f32.mrf.mxu1 }
 0x2ea   : > { %v2953_v52 = vmul.f32 1.442695, %v2952_v51 }
 0x2ec   : > { %3988 = vpow2.f32 %v2953_v52 }
 0x2f3   : > { %v3987_v31 = vpop.eup %3986 }
 0x2f4   : > { %v4467_v32 = vmul.f32 %v3987_v31, %v3985_v30 }
 0x2f9   : > { %v3989_v2 = vpop.eup %3988 }
 0x2fa   : > { %v2955_v6 = vadd.f32 1.0, %v3989_v2 }
 0x318   : > { %v2732_v37 = vpop.f32.mrf.mxu0 }
 0x319   : > { %v2733_v40 = vadd.f32 %v2732_v37, %v996_v35 }
 0x31a   : > { %v2734_v41 = vpop.f32.mrf.mxu0 }
 0x31b   : > { %v2735_v42 = vadd.f32 %v2734_v41, %v1000_v36 }
 0x31c   : > { %v2736_v43 = vpop.f32.mrf.mxu0 }
 0x31e   : > { %v2737_v44 = vpop.f32.mrf.mxu0 }
 0x323   : > { %v2773_v46 = vpop.f32.mrf.mxu1 }
 0x324   : > { %v2774_v53 = vadd.f32 %v2773_v46, %v2733_v40 }
 0x325   : > { %v2775_v38 = vpop.f32.mrf.mxu1 }
 0x326   : > { %v2776_v54 = vadd.f32 %v2775_v38, %v2735_v42 }
 0x327   : > { %v2777_v47 = vpop.f32.mrf.mxu1 }
 0x329   : > { %v2778_v49 = vpop.f32.mrf.mxu1 }
 0x338   : > { %v2814_v5 = vpop.f32.mrf.mxu0 }
 0x339   : > { %v2815_v55 = vadd.f32 %v2814_v5, %v2774_v53 }
 0x33a   : > { %v2816_v56 = vpop.f32.mrf.mxu0 }
 0x33b   : > { %v2958_v57 = vsub.f32 0.0, %v2815_v55  ;;  %v2817_v58 = vadd.f32 %v2816_v56, %v2776_v54 }
 0x33c   : > { %v2818_v59 = vpop.f32.mrf.mxu0 }
 0x33d   : > { %v2959_v39 = vmul.f32 1.442695, %v2958_v57  ;;  %v2965_v62 = vsub.f32 0.0, %v2817_v58 }
 0x33e   : > { %v2819_v63 = vpop.f32.mrf.mxu0 }
 0x33f   : > { %3990 = vpow2.f32 %v2959_v39  ;;  %v2966_v0 = vmul.f32 1.442695, %v2965_v62 }
 0x341   : > { %3992 = vpow2.f32 %v2966_v0 }
 0x342   : > { %3994 = vrcp.f32 %v2955_v6 }
 0x343   : > { %v3430_v48 = vpop.f32.mrf.mxu1 }
 0x345   : > { %v3431_v1 = vpop.f32.mrf.mxu1 }
 0x346   : > { %v3432_v20 = vadd.f32 %v3431_v1, %v3430_v48 }
 0x347   : > { %v3433_v4 = vpop.f32.mrf.mxu1 }
 0x348   : > { %v2856_v30 = vadd.f32 %v3432_v20, %v1004_v19 }
 0x349   : > { %v3434_v21 = vpop.f32.mrf.mxu1 }
 0x34c   : > { %v3991_v8 = vpop.eup %3990 }
 0x34d   : > { %v2961_v9 = vadd.f32 1.0, %v3991_v8 }
 0x34e   : > { %v3993_v12 = vpop.eup %3992 }
 0x34f   : > { %3996 = vrcp.f32 %v2961_v9  ;;  %v2968_v14 = vadd.f32 1.0, %v3993_v12  ;;  %v3995_v17 = vpop.eup %3994 }
 0x350   : > { %v2957_v23 = vmul.f32 %v3995_v17, %v4409_v45 }
 0x351   : > { %3998 = vrcp.f32 %v2968_v14 }
 0x358   : > { %v3452_v16 = vpop.f32.mrf.mxu0 }
 0x35a   : > { %v3453_v10 = vpop.f32.mrf.mxu0 }
 0x35b   : > { %v3454_v26 = vadd.f32 %v3453_v10, %v3452_v16 }
 0x35c   : > { %v3997_v18 = vpop.eup %3996  ;;  %v3455_v22 = vpop.f32.mrf.mxu0 }
 0x35d   : > { %v2963_v24 = vmul.f32 %v3997_v18, %v4418_v3  ;;  %v2896_v50 = vadd.f32 %v3454_v26, %v2856_v30  ;;  %v2946_v3 = vsub.f32 0.0, %v4459_v60 }
 0x35e   : > { %v3999_v25 = vpop.eup %3998  ;;  %v3456_v27 = vpop.f32.mrf.mxu0 }
 0x35f   : > { %v2964_v28 = vadd.f32 %v2963_v24, %v2957_v23  ;;  %v2970_v29 = vmul.f32 %v3999_v25, %v4442_v13  ;;  %v2947_v41 = vmul.f32 1.442695, %v2946_v3  ;;  %v2986_v13 = vstv %s2985_s19 }
 0x360   : > { %vm2987_vm6 = vcmp.lt.s32.totalorder %v4435_v61, %v2986_v13 }
 0x361   : > { %v2971_v31 = vadd.f32 %v2970_v29, %v2964_v28  ;;  %v3405_v60 = vsel %vm2987_vm6, 1.0, %v4208_v11 }
 0x363   : > { %v2935_v34 = vpop.f32.mrf.mxu1 }
 0x364   : > { %v2936_v35 = vadd.f32 %v2935_v34, %v2896_v50 }
 0x365   : > { %v3485_v7 = vpop.f32.mrf.mxu1 }
 0x366   : > { %v2972_v36 = vsub.f32 0.0, %v2936_v35 }
 0x367   : > { %v2938_v37 = vpop.f32.mrf.mxu1 }
 0x368   : > { %v2973_v40 = vmul.f32 1.442695, %v2972_v36 }
 0x369   : > { %v3486_v45 = vpop.f32.mrf.mxu1 }
 0x36a   : > { %4000 = vpow2.f32 %v2973_v40 }
 0x36b   : > { %4002 = vpow2.f32 %v2947_v41 }
 0x377   : > { %v4001_v42 = vpop.eup %4000 }
 0x378   : > { %v2975_v43 = vadd.f32 1.0, %v4001_v42  ;;  %v4003_v44 = vpop.eup %4002 }
 0x379   : > { %v2949_v47 = vadd.f32 1.0, %v4003_v44 }
 0x37a   : > { %4004 = vrcp.f32 %v2975_v43 }
 0x37b   : > { %4006 = vrcp.f32 %v2949_v47 }
 0x387   : > { %v4005_v46 = vpop.eup %4004 }
 0x388   : > { %v2977_v38 = vmul.f32 %v4005_v46, %v4447_v33  ;;  %v4007_v53 = vpop.eup %4006 }
 0x38a   : > { %v2978_v49 = vadd.f32 %v2977_v38, %v2971_v31 }
 0x38c   : > { %v2980_v51 = vadd.f32 %v4467_v32, %v2978_v49 }
 0x38e   : > { %4008 = vtanh.f32 %v2980_v51  ;;  %v2991_v52 = vmul.f32 %v3405_v60, %v2980_v51 }
 0x390   : > { %2999 = vst [vmem:[%s2997_s22 + $0x8] sm:$0xff] %v2991_v52 }
 0x39b   : > { %v4009_v33 = vpop.eup %4008 }
 0x39c   : > { %v2982_v5 = vmul.f32 %v4009_v33, %v4007_v53 }
 0x39e   : > { %v2990_v61 = vmul.f32 %v3405_v60, %v2982_v5 }
 0x3a0   : > { %2998 = vst [vmem:[%s2997_s22] sm:$0xff] %v2990_v61 }
 0x3a1   : > { %4137 = shalt.err (!%p4134_p0)
}
 0x3a2   : > { %s4213_s9 = smov 256   ;;  %s4214_s10 = smov 16  }
 0x3a3   : > { %3502 = dma.vmem_to_hbm [thread:$0]  (%p3526_p5), %s3007_s24, 1536, %s4516_s6, [#allocation6], %s4213_s9, %s4213_s9, %s4214_s10  }
 0x3a4   : > { %4179 = dma.done.wait (%p3526_p5), [#allocation6], 1536  }
 0x3a5   : > { %4181 = vsyncadd (%p3526_p5), [#allocation6], 4294965760 }
 0x3a6 PF: > { %p23_p6 = scmp.ge.s32.totalorder %s4324_s30, 7   ;;  %s4531_s24 = smov %s4188_s25 }
 0x3a7   : > { %s4532_s25 = smov %s4192_s26  ;;  %s4533_s26 = smov %s4334_s8 }
 0x3a8   : > { %s4534_s27 = smov %s4324_s30  ;;  %25 = sbr.rel (!%p23_p6) target bundleno = 11 (0xb), region = 97 }
 0x3ad   :  { %3022 = vsyncpa [#allocation5], 1 }
 0x3ae   :  { %3024 = vsyncpa [#allocation5 + $0x1], 1 }
 0x3af   :  { %3025 = vsyncpa [#allocation8], 1 }
 0x3b0   :  { %3026 = vsyncpa [#allocation11], 1 }
 0x3b1   :  { %3027 = vsyncpa [#allocation6], 1 }
 0x3b2   :  { %3029 = vsyncpa [#allocation6 + $0x1], 1 }

</bundles_post_ra>
